<compile_context>
chip_gen: v7x
topology: tpu7x:2x2x1
jax: 0.10.0
libtpu: 0.0.40
codegen_flags: <defaults>
</compile_context>

<pallas_src>
import functools

import jax
import jax.numpy as jnp
from jax.experimental import pallas as pl
from jax.experimental.pallas import tpu as pltpu


# --------------------------------- kernel helpers ---------------------------------
def _mish(v, approx):
    if approx:
        # mish(x) = x * (e^{2x} + 2 e^x) / (e^{2x} + 2 e^x + 2): 1 exp + 1 EUP approx recip
        ex = jnp.exp(jnp.minimum(v, 20.0))     # for x >= 20 the ratio is 1 anyway
        num = ex * (ex + 2.0)
        return v * num * pl.reciprocal(num + 2.0, approx=True)
    # exact mish for verification runs (avoid log1p: not all Mosaic versions lower it)
    sp = jnp.maximum(v, 0.0) + jnp.log(1.0 + jnp.exp(-jnp.abs(v)))
    return v * jnp.tanh(sp)


def _conv_taps(x3, w_ref, b_row, pad, md):
    """'same' Conv1d as K accumulated dots.  x3: (Bt, T, Cin) f32 (unpadded);
    w_ref: (K, Cin, Cout); boundary rows are zeroed in-register (no padded buffer)."""
    bt, T, cin = x3.shape
    K = w_ref.shape[0]
    cout = w_ref.shape[2]
    rows = x3.reshape(bt * T, cin).astype(md)
    acc = None
    for k in range(K):
        o = k - pad
        z = jnp.dot(rows, w_ref[k], preferred_element_type=jnp.float32)
        z = z.reshape(bt, T, cout)
        if o < 0:       # y[:, t] += x[:, t+o] @ W_k, zero for t < -o
            zpad = jnp.zeros((bt, -o, cout), jnp.float32)
            z = jnp.concatenate([zpad, z[:, :T + o, :]], axis=1)
        elif o > 0:     # zero for t >= T - o
            zpad = jnp.zeros((bt, o, cout), jnp.float32)
            z = jnp.concatenate([z[:, o:, :], zpad], axis=1)
        acc = z if acc is None else acc + z
    return acc + b_row                      # (1, Cout) broadcasts over (Bt, T, Cout)


def _group_norm(h, pg, gm, gamma_row, beta_row, eps):
    """h: (Bt, T, C).  pg: (C, G) group-average matrix with 1/(gsize*T) folded in;
    gm: (G, C) broadcast-back matrix.  gamma folded into a per-(batch,channel) scale
    so the big (Bt, T, C) map is one FMA."""
    bt = h.shape[0]
    s1 = jnp.sum(h, axis=1)                                          # (Bt, C)
    s2 = jnp.sum(h * h, axis=1)                                      # (Bt, C)
    s = jnp.concatenate([s1, s2], axis=0)                            # (2Bt, C)
    g = jnp.dot(s, pg, preferred_element_type=jnp.float32)           # (2Bt, G)
    gc = jnp.dot(g, gm, preferred_element_type=jnp.float32)          # (2Bt, C)
    mean, msq = gc[:bt], gc[bt:]
    var = msq - mean * mean
    inv = jax.lax.rsqrt(var + eps)
    scale = inv * gamma_row
    shift = beta_row - mean * scale
    return h * scale[:, None, :] + shift[:, None, :]


# ------------------------------------ kernel ------------------------------------
# row layout of the stacked (9, C_out) parameter array
_B1, _G1W, _G1B, _B2, _G2W, _G2B, _CBB, _CBS, _RESB = range(9)


def _cond_res_block_kernel(*refs, pad, eps, cond_predict_scale, has_res_conv,
                           approx_mish):
    it = iter(refs)
    x_ref = next(it)                      # (Bt, T, C_in)      f32
    cond_ref = next(it)                   # (Bt, 1, cond_dim)  f32
    w1_ref = next(it)                     # (K, C_in, C_out)   matmul dtype
    w2_ref = next(it)                     # (K, C_out, C_out)  matmul dtype
    if cond_predict_scale:
        cws_ref = next(it)                # (cond_dim, C_out)
    cwb_ref = next(it)                    # (cond_dim, C_out)
    if has_res_conv:
        rw_ref = next(it)                 # (C_in, C_out)
    rows_ref = next(it)                   # (9, C_out)         f32
    pg_ref = next(it)                     # (C_out, G)         f32
    gm_ref = next(it)                     # (G, C_out)         f32
    out_ref = next(it)

    md = w1_ref.dtype
    x = x_ref[...].astype(jnp.float32)                               # (Bt, T, C_in)
    rows = rows_ref[...]
    pg = pg_ref[...]
    gm = gm_ref[...]

    # ---- block 0: Conv1d (K accumulated dots) -> GroupNorm -> Mish ----
    h = _conv_taps(x, w1_ref, rows[_B1:_B1 + 1], pad, md)
    h = _group_norm(h, pg, gm, rows[_G1W:_G1W + 1], rows[_G1B:_G1B + 1], eps)
    h = _mish(h, approx_mish)

    # ---- FiLM conditioning: Mish -> Linear (pre-split scale/bias weights) ----
    cm = _mish(cond_ref[:, 0, :].astype(jnp.float32), approx_mish).astype(md)
    f_bias = jnp.dot(cm, cwb_ref[...],
                     preferred_element_type=jnp.float32) + rows[_CBB:_CBB + 1]
    if cond_predict_scale:
        f_scale = jnp.dot(cm, cws_ref[...],
                          preferred_element_type=jnp.float32) + rows[_CBS:_CBS + 1]
        h = h * f_scale[:, None, :] + f_bias[:, None, :]
    else:
        h = h + f_bias[:, None, :]

    # ---- block 1: Conv1d -> GroupNorm -> Mish ----
    h = _conv_taps(h, w2_ref, rows[_B2:_B2 + 1], pad, md)
    h = _group_norm(h, pg, gm, rows[_G2W:_G2W + 1], rows[_G2B:_G2B + 1], eps)
    h = _mish(h, approx_mish)

    # ---- residual path (1x1 conv if in_channels != out_channels, else identity) ----
    if has_res_conv:
        bt, T, cin = x.shape
        res = jnp.dot(x.reshape(bt * T, cin).astype(md), rw_ref[...],
                      preferred_element_type=jnp.float32).reshape(bt, T, -1)
        res = res + rows[_RESB:_RESB + 1]
    else:
        res = x
    out_ref[...] = (h + res).astype(out_ref.dtype)


# ------------------------------------ wrapper ------------------------------------
def _vmem_capacity():
    try:
        return int(pltpu.get_tpu_info().vmem_capacity_bytes)
    except Exception:
        return 64 << 20          # conservative fallback (v7x per-core VMEM)


def _pick_batch_tile(B, T, c_in, c_out, cond_dim, weight_bytes):
    cap = _vmem_capacity()
    budget = max(int(cap * 0.55) - int(weight_bytes), 1 << 20)
    # rough per-batch-element f32 bytes: x block (2-buf) + out block (2-buf)
    # + ~5 live (T, C_out) activation slabs + cond
    per_elem = 4 * (2 * T * c_in + 2 * T * c_out + 5 * T * c_out + 2 * cond_dim)
    bt = max(1, min(B, budget // max(per_elem, 1)))
    # v7x megacore: prefer >= 2 grid steps when each half still feeds >= 128 MXU rows
    if bt >= B and B >= 2 and ((B + 1) // 2) * T >= 128:
        bt = (B + 1) // 2
    return bt


def conditional_residual_block_1d(x_nct, cond, params, *, n_groups=8,
                                  cond_predict_scale=False, eps=1e-5,
                                  matmul_dtype=jnp.bfloat16, approx_mish=True,
                                  batch_tile=None):
    """x_nct: [B, C_in, T], cond: [B, cond_dim] -> [B, C_out, T] (PyTorch layout).

    matmul_dtype: dtype of MXU operands (conv / FiLM / residual weights and the
    activations fed to the dots).  bf16 is the native fast path on v5e/v6e/v7x;
    accumulation and all elementwise (GN / mish / FiLM apply) math stays f32.
    Pass matmul_dtype=jnp.float32, approx_mish=False for exact verification.
    """
    B, C_in, T = x_nct.shape
    w1 = params["w1"]
    C_out, K = w1.shape[0], w1.shape[2]
    pad = K // 2
    gsize = C_out // n_groups
    has_res_conv = C_in != C_out
    cond_dim = cond.shape[1]
    md = matmul_dtype

    # ----- layout glue: channels-last, NO time padding (edge taps handled in-kernel) -----
    # TODO(synk): when chained inside the UNet, keep activations in (B, T, C) between
    # blocks and drop these NCT<->BTC transposes (each is a full HBM round-trip).
    x_btc = jnp.transpose(x_nct, (0, 2, 1)).astype(jnp.float32)           # (B, T, C_in)
    cond3 = cond.astype(jnp.float32)[:, None, :]                          # (B, 1, cond_dim)

    # conv weights as per-tap matrices: (C_out, C_in, K) -> (K, C_in, C_out)
    w1_t = jnp.transpose(w1, (2, 1, 0)).astype(md)
    w2_t = jnp.transpose(params["w2"], (2, 1, 0)).astype(md)

    # FiLM linear, pre-split into scale/bias halves (kernel never slices lanes)
    cond_w = params["cond_w"]
    cond_b = params["cond_b"].astype(jnp.float32)
    if cond_predict_scale:
        cws = cond_w[:C_out].T.astype(md)                                 # (cond_dim, C_out)
        cwb = cond_w[C_out:2 * C_out].T.astype(md)
        cbs_v, cbb_v = cond_b[:C_out], cond_b[C_out:2 * C_out]
    else:
        cws = None
        cwb = cond_w.T.astype(md)
        cbs_v = jnp.zeros((C_out,), jnp.float32)
        cbb_v = cond_b
    if has_res_conv:
        rw = params["res_w"][:, :, 0].T.astype(md)                        # (C_in, C_out)
        resb_v = params["res_b"].astype(jnp.float32)
    else:
        rw = None
        resb_v = jnp.zeros((C_out,), jnp.float32)

    # all (1, C_out) row parameters stacked into one (9, C_out) f32 array
    f32 = lambda v: v.astype(jnp.float32)
    rows = jnp.stack([f32(params["b1"]), f32(params["gn1_w"]), f32(params["gn1_b"]),
                      f32(params["b2"]), f32(params["gn2_w"]), f32(params["gn2_b"]),
                      cbb_v, cbs_v, resb_v], axis=0)                      # (9, C_out)

    # group-average (C, G) with 1/(gsize*T) folded in + (G, C) broadcast-back (both f32)
    gid = jnp.arange(C_out) // gsize
    gar = jnp.arange(n_groups)
    pg = (gid[:, None] == gar[None, :]).astype(jnp.float32) / float(gsize * T)
    gm = (gar[:, None] == gid[None, :]).astype(jnp.float32)

    # weight-resident VMEM estimate (single-buffered via pl.Buffered(1))
    bw = jnp.dtype(md).itemsize
    weight_bytes = bw * (w1_t.size + w2_t.size + cwb.size
                         + (cws.size if cond_predict_scale else 0)
                         + (rw.size if has_res_conv else 0)) \
        + 4 * (rows.size + pg.size + gm.size)

    bt = batch_tile if batch_tile is not None else _pick_batch_tile(
        B, T, C_in, C_out, cond_dim, weight_bytes)
    grid_b = pl.cdiv(B, bt)
    Bp = grid_b * bt
    if Bp != B:                      # pad batch instead of shrinking bt to a poor divisor
        x_btc = jnp.pad(x_btc, ((0, Bp - B), (0, 0), (0, 0)))
        cond3 = jnp.pad(cond3, ((0, Bp - B), (0, 0), (0, 0)))

    inputs = [x_btc, cond3, w1_t, w2_t]
    if cond_predict_scale:
        inputs.append(cws)
    inputs.append(cwb)
    if has_res_conv:
        inputs.append(rw)
    inputs += [rows, pg, gm]

    kern = functools.partial(_cond_res_block_kernel, pad=pad, eps=float(eps),
                             cond_predict_scale=cond_predict_scale,
                             has_res_conv=has_res_conv, approx_mish=approx_mish)

    cap = _vmem_capacity()
    vmem_limit = min(100 << 20, cap * 3 // 4)      # ~96 MiB on 128 MiB parts, 48 MiB on v7x

    def _run(single_buffer_weights):
        if single_buffer_weights:
            wspec = lambda s: pl.BlockSpec(s, lambda b: (0,) * len(s),
                                           pipeline_mode=pl.Buffered(1))
        else:
            wspec = lambda s: pl.BlockSpec(s, lambda b: (0,) * len(s))
        in_specs = [pl.BlockSpec((bt, T, C_in), lambda b: (b, 0, 0)),
                    pl.BlockSpec((bt, 1, cond_dim), lambda b: (b, 0, 0)),
                    wspec((K, C_in, C_out)), wspec((K, C_out, C_out))]
        if cond_predict_scale:
            in_specs.append(wspec((cond_dim, C_out)))
        in_specs.append(wspec((cond_dim, C_out)))
        if has_res_conv:
            in_specs.append(wspec((C_in, C_out)))
        in_specs += [wspec((9, C_out)), wspec((C_out, n_groups)), wspec((n_groups, C_out))]

        grid_spec = pltpu.PrefetchScalarGridSpec(
            num_scalar_prefetch=0, grid=(grid_b,),
            in_specs=in_specs,
            out_specs=pl.BlockSpec((bt, T, C_out), lambda b: (b, 0, 0)))
        return pl.pallas_call(
            kern,
            out_shape=jax.ShapeDtypeStruct((Bp, T, C_out), jnp.float32),
            grid_spec=grid_spec,
            compiler_params=pltpu.CompilerParams(
                dimension_semantics=("parallel",),      # batch axis shards across TCs
                vmem_limit_bytes=int(vmem_limit)),
        )(*inputs)

    try:
        out_btc = _run(True)
    except Exception:
        # TODO(synk): drop this fallback once pl.Buffered(1) single-buffering of
        # block-invariant weight operands is confirmed on the deployed jaxlib.
        out_btc = _run(False)

    return jnp.transpose(out_btc[:B], (0, 2, 1))       # back to [B, C_out, T]


# ----------------------- pure-JAX reference (PyTorch semantics) -----------------------
def _mish_ref(v):
    sp = jnp.maximum(v, 0.0) + jnp.log1p(jnp.exp(-jnp.abs(v)))
    return v * jnp.tanh(sp)


def reference_forward(x, cond, params, n_groups, cond_predict_scale, eps=1e-5):
    def conv1d(h, w, b, pad):
        y = jax.lax.conv_general_dilated(h, w, (1,), [(pad, pad)],
                                         dimension_numbers=("NCH", "OIH", "NCH"))
        return y + b[None, :, None]

    def gn(h, gamma, beta):
        B, C, T = h.shape
        hg = h.reshape(B, n_groups, (C // n_groups) * T)
        mean = hg.mean(axis=2, keepdims=True)
        var = hg.var(axis=2, keepdims=True)
        hn = ((hg - mean) / jnp.sqrt(var + eps)).reshape(B, C, T)
        return hn * gamma[None, :, None] + beta[None, :, None]

    C_out = params["w1"].shape[0]
    pad = params["w1"].shape[2] // 2
    h = _mish_ref(gn(conv1d(x, params["w1"], params["b1"], pad),
                     params["gn1_w"], params["gn1_b"]))
    embed = _mish_ref(cond) @ params["cond_w"].T + params["cond_b"]
    embed = embed[:, :, None]
    if cond_predict_scale:
        embed = embed.reshape(embed.shape[0], 2, C_out, 1)
        h = embed[:, 0] * h + embed[:, 1]
    else:
        h = h + embed
    h = _mish_ref(gn(conv1d(h, params["w2"], params["b2"], pad),
                     params["gn2_w"], params["gn2_b"]))
    if x.shape[1] != C_out:
        res = conv1d(x, params["res_w"], params["res_b"], 0)
    else:
        res = x
    return h + res


if __name__ == "__main__":
    B, C_in, C_out, T = 2, 4, 8, 16
    cond_dim, K, n_groups = 16, 3, 8
    cond_predict_scale = True
    cond_ch = C_out * 2 if cond_predict_scale else C_out

    key = jax.random.PRNGKey(0)
    ks = jax.random.split(key, 16)
    u = lambda k, shape, s=0.3: jax.random.normal(k, shape, jnp.float32) * s

    params = dict(
        w1=u(ks[0], (C_out, C_in, K)), b1=u(ks[1], (C_out,)),
        gn1_w=1.0 + u(ks[2], (C_out,)), gn1_b=u(ks[3], (C_out,)),
        w2=u(ks[4], (C_out, C_out, K)), b2=u(ks[5], (C_out,)),
        gn2_w=1.0 + u(ks[6], (C_out,)), gn2_b=u(ks[7], (C_out,)),
        cond_w=u(ks[8], (cond_ch, cond_dim)), cond_b=u(ks[9], (cond_ch,)),
        res_w=u(ks[10], (C_out, C_in, 1)), res_b=u(ks[11], (C_out,)),
    )
    x = jax.random.normal(ks[12], (B, C_in, T), jnp.float32)
    cond = jax.random.normal(ks[13], (B, cond_dim), jnp.float32)

    ref = reference_forward(x, cond, params, n_groups, cond_predict_scale)

    # exact-verification mode: f32 MXU operands + exact mish
    out_precise = conditional_residual_block_1d(
        x, cond, params, n_groups=n_groups, cond_predict_scale=cond_predict_scale,
        matmul_dtype=jnp.float32, approx_mish=False)
    out_precise = jax.block_until_ready(out_precise)
    assert out_precise.shape == (B, C_out, T), out_precise.shape
    err_p = float(jnp.max(jnp.abs(out_precise - ref)))
    assert jnp.allclose(out_precise, ref, atol=2e-3, rtol=2e-3), \
        f"precise-mode max abs err {err_p}"

    # fast (default) mode: bf16 MXU operands + EUP approx mish, f32 accumulation
    out_fast = conditional_residual_block_1d(
        x, cond, params, n_groups=n_groups, cond_predict_scale=cond_predict_scale)
    out_fast = jax.block_until_ready(out_fast)
    assert out_fast.shape == (B, C_out, T), out_fast.shape
    err_f = float(jnp.max(jnp.abs(out_fast - ref)))
    assert jnp.allclose(out_fast, ref, atol=1e-1, rtol=1e-1), \
        f"fast-mode max abs err {err_f}"

    print("KERNEL_OK")
</pallas_src>

<mosaic_0001>
module attributes {stable_mosaic.version = 11 : i64} {
  func.func @_cond_res_block_kernel(%arg0: i32, %arg1: memref<2x16x4xf32, #tpu.memory_space<vmem>>, %arg2: memref<2x1x16xf32, #tpu.memory_space<vmem>>, %arg3: memref<3x4x8xf32, #tpu.memory_space<vmem>>, %arg4: memref<3x8x8xf32, #tpu.memory_space<vmem>>, %arg5: memref<16x8xf32, #tpu.memory_space<vmem>>, %arg6: memref<16x8xf32, #tpu.memory_space<vmem>>, %arg7: memref<4x8xf32, #tpu.memory_space<vmem>>, %arg8: memref<9x8xf32, #tpu.memory_space<vmem>>, %arg9: memref<8x8xf32, #tpu.memory_space<vmem>>, %arg10: memref<8x8xf32, #tpu.memory_space<vmem>>, %arg11: memref<2x16x8xf32, #tpu.memory_space<vmem>>) attributes {dimension_semantics = [#tpu.dimension_semantics<parallel>], iteration_bounds = array<i64: 1>, scalar_prefetch = 0 : i64, scratch_operands = 0 : i64, tpu.core_type = #tpu.core_type<tc>, window_params = [{transform_indices = @transform_0, window_bounds = array<i64: 2, 16, 4>}, {transform_indices = @transform_1, window_bounds = array<i64: 2, 1, 16>}, {pipeline_mode = #tpu.pipeline_mode<synchronous>, transform_indices = @transform_2, window_bounds = array<i64: 3, 4, 8>}, {pipeline_mode = #tpu.pipeline_mode<synchronous>, transform_indices = @transform_3, window_bounds = array<i64: 3, 8, 8>}, {pipeline_mode = #tpu.pipeline_mode<synchronous>, transform_indices = @transform_4, window_bounds = array<i64: 16, 8>}, {pipeline_mode = #tpu.pipeline_mode<synchronous>, transform_indices = @transform_5, window_bounds = array<i64: 16, 8>}, {pipeline_mode = #tpu.pipeline_mode<synchronous>, transform_indices = @transform_6, window_bounds = array<i64: 4, 8>}, {pipeline_mode = #tpu.pipeline_mode<synchronous>, transform_indices = @transform_7, window_bounds = array<i64: 9, 8>}, {pipeline_mode = #tpu.pipeline_mode<synchronous>, transform_indices = @transform_8, window_bounds = array<i64: 8, 8>}, {pipeline_mode = #tpu.pipeline_mode<synchronous>, transform_indices = @transform_9, window_bounds = array<i64: 8, 8>}, {transform_indices = @transform_10, window_bounds = array<i64: 2, 16, 8>}]} {
    %c0 = arith.constant 0 : index
    %c0_0 = arith.constant 0 : index
    %c0_1 = arith.constant 0 : index
    %0 = vector.load %arg1[%c0, %c0_0, %c0_1] : memref<2x16x4xf32, #tpu.memory_space<vmem>>, vector<2x16x4xf32>
    %c0_2 = arith.constant 0 : index
    %c0_3 = arith.constant 0 : index
    %1 = vector.load %arg8[%c0_2, %c0_3] : memref<9x8xf32, #tpu.memory_space<vmem>>, vector<9x8xf32>
    %c0_4 = arith.constant 0 : index
    %c0_5 = arith.constant 0 : index
    %2 = vector.load %arg9[%c0_4, %c0_5] : memref<8x8xf32, #tpu.memory_space<vmem>>, vector<8x8xf32>
    %c0_6 = arith.constant 0 : index
    %c0_7 = arith.constant 0 : index
    %3 = vector.load %arg10[%c0_6, %c0_7] : memref<8x8xf32, #tpu.memory_space<vmem>>, vector<8x8xf32>
    %4 = vector.extract_strided_slice %1 {offsets = [0, 0], sizes = [1, 8], strides = [1, 1]} : vector<9x8xf32> to vector<1x8xf32>
    %5 = vector.shape_cast %0 : vector<2x16x4xf32> to vector<32x4xf32>
    %c0_8 = arith.constant 0 : index
    %c0_9 = arith.constant 0 : index
    %c0_10 = arith.constant 0 : index
    %6 = vector.load %arg3[%c0_8, %c0_9, %c0_10] : memref<3x4x8xf32, #tpu.memory_space<vmem>>, vector<1x4x8xf32>
    %7 = vector.shape_cast %6 : vector<1x4x8xf32> to vector<4x8xf32>
    %cst = arith.constant dense<0.000000e+00> : vector<32x8xf32>
    %8 = tpu.matmul %5, %7, %cst {dimension_numbers = #tpu.dot_dimension_numbers<[1], [0], [0], [1], [0, 0, 1, 1], [], []>} : vector<32x4xf32>, vector<4x8xf32>, vector<32x8xf32> -> vector<32x8xf32>
    %9 = vector.shape_cast %8 : vector<32x8xf32> to vector<2x16x8xf32>
    %cst_11 = arith.constant 0.000000e+00 : f32
    %10 = vector.broadcast %cst_11 : f32 to vector<2x1x8xf32>
    %11 = vector.extract_strided_slice %9 {offsets = [0, 0, 0], sizes = [2, 15, 8], strides = [1, 1, 1]} : vector<2x16x8xf32> to vector<2x15x8xf32>
    %12 = tpu.concatenate %10, %11 in 1 : vector<2x1x8xf32>, vector<2x15x8xf32> -> vector<2x16x8xf32>
    %c1 = arith.constant 1 : index
    %c0_12 = arith.constant 0 : index
    %c0_13 = arith.constant 0 : index
    %13 = vector.load %arg3[%c1, %c0_12, %c0_13] : memref<3x4x8xf32, #tpu.memory_space<vmem>>, vector<1x4x8xf32>
    %14 = vector.shape_cast %13 : vector<1x4x8xf32> to vector<4x8xf32>
    %cst_14 = arith.constant dense<0.000000e+00> : vector<32x8xf32>
    %15 = tpu.matmul %5, %14, %cst_14 {dimension_numbers = #tpu.dot_dimension_numbers<[1], [0], [0], [1], [0, 0, 1, 1], [], []>} : vector<32x4xf32>, vector<4x8xf32>, vector<32x8xf32> -> vector<32x8xf32>
    %16 = vector.shape_cast %15 : vector<32x8xf32> to vector<2x16x8xf32>
    %17 = arith.addf %12, %16 : vector<2x16x8xf32>
    %c2 = arith.constant 2 : index
    %c0_15 = arith.constant 0 : index
    %c0_16 = arith.constant 0 : index
    %18 = vector.load %arg3[%c2, %c0_15, %c0_16] : memref<3x4x8xf32, #tpu.memory_space<vmem>>, vector<1x4x8xf32>
    %19 = vector.shape_cast %18 : vector<1x4x8xf32> to vector<4x8xf32>
    %cst_17 = arith.constant dense<0.000000e+00> : vector<32x8xf32>
    %20 = tpu.matmul %5, %19, %cst_17 {dimension_numbers = #tpu.dot_dimension_numbers<[1], [0], [0], [1], [0, 0, 1, 1], [], []>} : vector<32x4xf32>, vector<4x8xf32>, vector<32x8xf32> -> vector<32x8xf32>
    %21 = vector.shape_cast %20 : vector<32x8xf32> to vector<2x16x8xf32>
    %cst_18 = arith.constant 0.000000e+00 : f32
    %22 = vector.broadcast %cst_18 : f32 to vector<2x1x8xf32>
    %23 = vector.extract_strided_slice %21 {offsets = [0, 1, 0], sizes = [2, 15, 8], strides = [1, 1, 1]} : vector<2x16x8xf32> to vector<2x15x8xf32>
    %24 = tpu.concatenate %23, %22 in 1 : vector<2x15x8xf32>, vector<2x1x8xf32> -> vector<2x16x8xf32>
    %25 = arith.addf %17, %24 : vector<2x16x8xf32>
    %26 = vector.shape_cast %4 : vector<1x8xf32> to vector<1x1x8xf32>
    %27 = vector.broadcast %26 : vector<1x1x8xf32> to vector<2x16x8xf32>
    %28 = arith.addf %25, %27 : vector<2x16x8xf32>
    %29 = vector.extract_strided_slice %1 {offsets = [1, 0], sizes = [1, 8], strides = [1, 1]} : vector<9x8xf32> to vector<1x8xf32>
    %30 = vector.extract_strided_slice %1 {offsets = [2, 0], sizes = [1, 8], strides = [1, 1]} : vector<9x8xf32> to vector<1x8xf32>
    %cst_19 = arith.constant dense<0.000000e+00> : vector<2x8xf32>
    %31 = vector.multi_reduction <add>, %28, %cst_19 [1] : vector<2x16x8xf32> to vector<2x8xf32>
    %32 = arith.mulf %28, %28 : vector<2x16x8xf32>
    %cst_20 = arith.constant dense<0.000000e+00> : vector<2x8xf32>
    %33 = vector.multi_reduction <add>, %32, %cst_20 [1] : vector<2x16x8xf32> to vector<2x8xf32>
    %34 = tpu.concatenate %31, %33 in 0 : vector<2x8xf32>, vector<2x8xf32> -> vector<4x8xf32>
    %cst_21 = arith.constant dense<0.000000e+00> : vector<4x8xf32>
    %35 = tpu.matmul %34, %2, %cst_21 {dimension_numbers = #tpu.dot_dimension_numbers<[1], [0], [0], [1], [0, 0, 1, 1], [], []>} : vector<4x8xf32>, vector<8x8xf32>, vector<4x8xf32> -> vector<4x8xf32>
    %cst_22 = arith.constant dense<0.000000e+00> : vector<4x8xf32>
    %36 = tpu.matmul %35, %3, %cst_22 {dimension_numbers = #tpu.dot_dimension_numbers<[1], [0], [0], [1], [0, 0, 1, 1], [], []>} : vector<4x8xf32>, vector<8x8xf32>, vector<4x8xf32> -> vector<4x8xf32>
    %37 = vector.extract_strided_slice %36 {offsets = [0, 0], sizes = [2, 8], strides = [1, 1]} : vector<4x8xf32> to vector<2x8xf32>
    %38 = vector.extract_strided_slice %36 {offsets = [2, 0], sizes = [2, 8], strides = [1, 1]} : vector<4x8xf32> to vector<2x8xf32>
    %39 = arith.mulf %37, %37 : vector<2x8xf32>
    %40 = arith.subf %38, %39 : vector<2x8xf32>
    %cst_23 = arith.constant 9.99999974E-6 : f32
    %41 = vector.broadcast %cst_23 : f32 to vector<2x8xf32>
    %42 = arith.addf %40, %41 : vector<2x8xf32>
    %43 = math.rsqrt %42 : vector<2x8xf32>
    %44 = vector.broadcast %29 : vector<1x8xf32> to vector<2x8xf32>
    %45 = arith.mulf %43, %44 : vector<2x8xf32>
    %46 = arith.mulf %37, %45 : vector<2x8xf32>
    %47 = vector.broadcast %30 : vector<1x8xf32> to vector<2x8xf32>
    %48 = arith.subf %47, %46 : vector<2x8xf32>
    %49 = vector.shape_cast %45 : vector<2x8xf32> to vector<2x1x8xf32>
    %50 = vector.broadcast %49 : vector<2x1x8xf32> to vector<2x16x8xf32>
    %51 = arith.mulf %28, %50 : vector<2x16x8xf32>
    %52 = vector.shape_cast %48 : vector<2x8xf32> to vector<2x1x8xf32>
    %53 = vector.broadcast %52 : vector<2x1x8xf32> to vector<2x16x8xf32>
    %54 = arith.addf %51, %53 : vector<2x16x8xf32>
    %cst_24 = arith.constant 0.000000e+00 : f32
    %55 = vector.broadcast %cst_24 : f32 to vector<2x16x8xf32>
    %56 = arith.maximumf %54, %55 : vector<2x16x8xf32>
    %57 = math.absf %54 : vector<2x16x8xf32>
    %cst_25 = arith.constant 0.000000e+00 : f32
    %58 = vector.broadcast %cst_25 : f32 to vector<2x16x8xf32>
    %59 = arith.subf %58, %57 : vector<2x16x8xf32>
    %60 = math.exp %59 : vector<2x16x8xf32>
    %cst_26 = arith.constant 1.000000e+00 : f32
    %61 = vector.broadcast %cst_26 : f32 to vector<2x16x8xf32>
    %62 = arith.addf %61, %60 : vector<2x16x8xf32>
    %63 = math.log %62 : vector<2x16x8xf32>
    %64 = arith.addf %56, %63 : vector<2x16x8xf32>
    %65 = math.tanh %64 : vector<2x16x8xf32>
    %66 = arith.mulf %54, %65 : vector<2x16x8xf32>
    %c0_27 = arith.constant 0 : index
    %c0_28 = arith.constant 0 : index
    %c0_29 = arith.constant 0 : index
    %67 = vector.load %arg2[%c0_27, %c0_28, %c0_29] : memref<2x1x16xf32, #tpu.memory_space<vmem>>, vector<2x1x16xf32>
    %68 = vector.shape_cast %67 : vector<2x1x16xf32> to vector<2x16xf32>
    %cst_30 = arith.constant 0.000000e+00 : f32
    %69 = vector.broadcast %cst_30 : f32 to vector<2x16xf32>
    %70 = arith.maximumf %68, %69 : vector<2x16xf32>
    %71 = math.absf %68 : vector<2x16xf32>
    %cst_31 = arith.constant 0.000000e+00 : f32
    %72 = vector.broadcast %cst_31 : f32 to vector<2x16xf32>
    %73 = arith.subf %72, %71 : vector<2x16xf32>
    %74 = math.exp %73 : vector<2x16xf32>
    %cst_32 = arith.constant 1.000000e+00 : f32
    %75 = vector.broadcast %cst_32 : f32 to vector<2x16xf32>
    %76 = arith.addf %75, %74 : vector<2x16xf32>
    %77 = math.log %76 : vector<2x16xf32>
    %78 = arith.addf %70, %77 : vector<2x16xf32>
    %79 = math.tanh %78 : vector<2x16xf32>
    %80 = arith.mulf %68, %79 : vector<2x16xf32>
    %c0_33 = arith.constant 0 : index
    %c0_34 = arith.constant 0 : index
    %81 = vector.load %arg6[%c0_33, %c0_34] : memref<16x8xf32, #tpu.memory_space<vmem>>, vector<16x8xf32>
    %cst_35 = arith.constant dense<0.000000e+00> : vector<2x8xf32>
    %82 = tpu.matmul %80, %81, %cst_35 {dimension_numbers = #tpu.dot_dimension_numbers<[1], [0], [0], [1], [0, 0, 1, 1], [], []>} : vector<2x16xf32>, vector<16x8xf32>, vector<2x8xf32> -> vector<2x8xf32>
    %83 = vector.extract_strided_slice %1 {offsets = [6, 0], sizes = [1, 8], strides = [1, 1]} : vector<9x8xf32> to vector<1x8xf32>
    %84 = vector.broadcast %83 : vector<1x8xf32> to vector<2x8xf32>
    %85 = arith.addf %82, %84 : vector<2x8xf32>
    %c0_36 = arith.constant 0 : index
    %c0_37 = arith.constant 0 : index
    %86 = vector.load %arg5[%c0_36, %c0_37] : memref<16x8xf32, #tpu.memory_space<vmem>>, vector<16x8xf32>
    %cst_38 = arith.constant dense<0.000000e+00> : vector<2x8xf32>
    %87 = tpu.matmul %80, %86, %cst_38 {dimension_numbers = #tpu.dot_dimension_numbers<[1], [0], [0], [1], [0, 0, 1, 1], [], []>} : vector<2x16xf32>, vector<16x8xf32>, vector<2x8xf32> -> vector<2x8xf32>
    %88 = vector.extract_strided_slice %1 {offsets = [7, 0], sizes = [1, 8], strides = [1, 1]} : vector<9x8xf32> to vector<1x8xf32>
    %89 = vector.broadcast %88 : vector<1x8xf32> to vector<2x8xf32>
    %90 = arith.addf %87, %89 : vector<2x8xf32>
    %91 = vector.shape_cast %90 : vector<2x8xf32> to vector<2x1x8xf32>
    %92 = vector.broadcast %91 : vector<2x1x8xf32> to vector<2x16x8xf32>
    %93 = arith.mulf %66, %92 : vector<2x16x8xf32>
    %94 = vector.shape_cast %85 : vector<2x8xf32> to vector<2x1x8xf32>
    %95 = vector.broadcast %94 : vector<2x1x8xf32> to vector<2x16x8xf32>
    %96 = arith.addf %93, %95 : vector<2x16x8xf32>
    %97 = vector.extract_strided_slice %1 {offsets = [3, 0], sizes = [1, 8], strides = [1, 1]} : vector<9x8xf32> to vector<1x8xf32>
    %98 = vector.shape_cast %96 : vector<2x16x8xf32> to vector<32x8xf32>
    %c0_39 = arith.constant 0 : index
    %c0_40 = arith.constant 0 : index
    %c0_41 = arith.constant 0 : index
    %99 = vector.load %arg4[%c0_39, %c0_40, %c0_41] : memref<3x8x8xf32, #tpu.memory_space<vmem>>, vector<1x8x8xf32>
    %100 = vector.shape_cast %99 : vector<1x8x8xf32> to vector<8x8xf32>
    %cst_42 = arith.constant dense<0.000000e+00> : vector<32x8xf32>
    %101 = tpu.matmul %98, %100, %cst_42 {dimension_numbers = #tpu.dot_dimension_numbers<[1], [0], [0], [1], [0, 0, 1, 1], [], []>} : vector<32x8xf32>, vector<8x8xf32>, vector<32x8xf32> -> vector<32x8xf32>
    %102 = vector.shape_cast %101 : vector<32x8xf32> to vector<2x16x8xf32>
    %cst_43 = arith.constant 0.000000e+00 : f32
    %103 = vector.broadcast %cst_43 : f32 to vector<2x1x8xf32>
    %104 = vector.extract_strided_slice %102 {offsets = [0, 0, 0], sizes = [2, 15, 8], strides = [1, 1, 1]} : vector<2x16x8xf32> to vector<2x15x8xf32>
    %105 = tpu.concatenate %103, %104 in 1 : vector<2x1x8xf32>, vector<2x15x8xf32> -> vector<2x16x8xf32>
    %c1_44 = arith.constant 1 : index
    %c0_45 = arith.constant 0 : index
    %c0_46 = arith.constant 0 : index
    %106 = vector.load %arg4[%c1_44, %c0_45, %c0_46] : memref<3x8x8xf32, #tpu.memory_space<vmem>>, vector<1x8x8xf32>
    %107 = vector.shape_cast %106 : vector<1x8x8xf32> to vector<8x8xf32>
    %cst_47 = arith.constant dense<0.000000e+00> : vector<32x8xf32>
    %108 = tpu.matmul %98, %107, %cst_47 {dimension_numbers = #tpu.dot_dimension_numbers<[1], [0], [0], [1], [0, 0, 1, 1], [], []>} : vector<32x8xf32>, vector<8x8xf32>, vector<32x8xf32> -> vector<32x8xf32>
    %109 = vector.shape_cast %108 : vector<32x8xf32> to vector<2x16x8xf32>
    %110 = arith.addf %105, %109 : vector<2x16x8xf32>
    %c2_48 = arith.constant 2 : index
    %c0_49 = arith.constant 0 : index
    %c0_50 = arith.constant 0 : index
    %111 = vector.load %arg4[%c2_48, %c0_49, %c0_50] : memref<3x8x8xf32, #tpu.memory_space<vmem>>, vector<1x8x8xf32>
    %112 = vector.shape_cast %111 : vector<1x8x8xf32> to vector<8x8xf32>
    %cst_51 = arith.constant dense<0.000000e+00> : vector<32x8xf32>
    %113 = tpu.matmul %98, %112, %cst_51 {dimension_numbers = #tpu.dot_dimension_numbers<[1], [0], [0], [1], [0, 0, 1, 1], [], []>} : vector<32x8xf32>, vector<8x8xf32>, vector<32x8xf32> -> vector<32x8xf32>
    %114 = vector.shape_cast %113 : vector<32x8xf32> to vector<2x16x8xf32>
    %cst_52 = arith.constant 0.000000e+00 : f32
    %115 = vector.broadcast %cst_52 : f32 to vector<2x1x8xf32>
    %116 = vector.extract_strided_slice %114 {offsets = [0, 1, 0], sizes = [2, 15, 8], strides = [1, 1, 1]} : vector<2x16x8xf32> to vector<2x15x8xf32>
    %117 = tpu.concatenate %116, %115 in 1 : vector<2x15x8xf32>, vector<2x1x8xf32> -> vector<2x16x8xf32>
    %118 = arith.addf %110, %117 : vector<2x16x8xf32>
    %119 = vector.shape_cast %97 : vector<1x8xf32> to vector<1x1x8xf32>
    %120 = vector.broadcast %119 : vector<1x1x8xf32> to vector<2x16x8xf32>
    %121 = arith.addf %118, %120 : vector<2x16x8xf32>
    %122 = vector.extract_strided_slice %1 {offsets = [4, 0], sizes = [1, 8], strides = [1, 1]} : vector<9x8xf32> to vector<1x8xf32>
    %123 = vector.extract_strided_slice %1 {offsets = [5, 0], sizes = [1, 8], strides = [1, 1]} : vector<9x8xf32> to vector<1x8xf32>
    %cst_53 = arith.constant dense<0.000000e+00> : vector<2x8xf32>
    %124 = vector.multi_reduction <add>, %121, %cst_53 [1] : vector<2x16x8xf32> to vector<2x8xf32>
    %125 = arith.mulf %121, %121 : vector<2x16x8xf32>
    %cst_54 = arith.constant dense<0.000000e+00> : vector<2x8xf32>
    %126 = vector.multi_reduction <add>, %125, %cst_54 [1] : vector<2x16x8xf32> to vector<2x8xf32>
    %127 = tpu.concatenate %124, %126 in 0 : vector<2x8xf32>, vector<2x8xf32> -> vector<4x8xf32>
    %cst_55 = arith.constant dense<0.000000e+00> : vector<4x8xf32>
    %128 = tpu.matmul %127, %2, %cst_55 {dimension_numbers = #tpu.dot_dimension_numbers<[1], [0], [0], [1], [0, 0, 1, 1], [], []>} : vector<4x8xf32>, vector<8x8xf32>, vector<4x8xf32> -> vector<4x8xf32>
    %cst_56 = arith.constant dense<0.000000e+00> : vector<4x8xf32>
    %129 = tpu.matmul %128, %3, %cst_56 {dimension_numbers = #tpu.dot_dimension_numbers<[1], [0], [0], [1], [0, 0, 1, 1], [], []>} : vector<4x8xf32>, vector<8x8xf32>, vector<4x8xf32> -> vector<4x8xf32>
    %130 = vector.extract_strided_slice %129 {offsets = [0, 0], sizes = [2, 8], strides = [1, 1]} : vector<4x8xf32> to vector<2x8xf32>
    %131 = vector.extract_strided_slice %129 {offsets = [2, 0], sizes = [2, 8], strides = [1, 1]} : vector<4x8xf32> to vector<2x8xf32>
    %132 = arith.mulf %130, %130 : vector<2x8xf32>
    %133 = arith.subf %131, %132 : vector<2x8xf32>
    %cst_57 = arith.constant 9.99999974E-6 : f32
    %134 = vector.broadcast %cst_57 : f32 to vector<2x8xf32>
    %135 = arith.addf %133, %134 : vector<2x8xf32>
    %136 = math.rsqrt %135 : vector<2x8xf32>
    %137 = vector.broadcast %122 : vector<1x8xf32> to vector<2x8xf32>
    %138 = arith.mulf %136, %137 : vector<2x8xf32>
    %139 = arith.mulf %130, %138 : vector<2x8xf32>
    %140 = vector.broadcast %123 : vector<1x8xf32> to vector<2x8xf32>
    %141 = arith.subf %140, %139 : vector<2x8xf32>
    %142 = vector.shape_cast %138 : vector<2x8xf32> to vector<2x1x8xf32>
    %143 = vector.broadcast %142 : vector<2x1x8xf32> to vector<2x16x8xf32>
    %144 = arith.mulf %121, %143 : vector<2x16x8xf32>
    %145 = vector.shape_cast %141 : vector<2x8xf32> to vector<2x1x8xf32>
    %146 = vector.broadcast %145 : vector<2x1x8xf32> to vector<2x16x8xf32>
    %147 = arith.addf %144, %146 : vector<2x16x8xf32>
    %cst_58 = arith.constant 0.000000e+00 : f32
    %148 = vector.broadcast %cst_58 : f32 to vector<2x16x8xf32>
    %149 = arith.maximumf %147, %148 : vector<2x16x8xf32>
    %150 = math.absf %147 : vector<2x16x8xf32>
    %cst_59 = arith.constant 0.000000e+00 : f32
    %151 = vector.broadcast %cst_59 : f32 to vector<2x16x8xf32>
    %152 = arith.subf %151, %150 : vector<2x16x8xf32>
    %153 = math.exp %152 : vector<2x16x8xf32>
    %cst_60 = arith.constant 1.000000e+00 : f32
    %154 = vector.broadcast %cst_60 : f32 to vector<2x16x8xf32>
    %155 = arith.addf %154, %153 : vector<2x16x8xf32>
    %156 = math.log %155 : vector<2x16x8xf32>
    %157 = arith.addf %149, %156 : vector<2x16x8xf32>
    %158 = math.tanh %157 : vector<2x16x8xf32>
    %159 = arith.mulf %147, %158 : vector<2x16x8xf32>
    %160 = vector.shape_cast %0 : vector<2x16x4xf32> to vector<32x4xf32>
    %c0_61 = arith.constant 0 : index
    %c0_62 = arith.constant 0 : index
    %161 = vector.load %arg7[%c0_61, %c0_62] : memref<4x8xf32, #tpu.memory_space<vmem>>, vector<4x8xf32>
    %cst_63 = arith.constant dense<0.000000e+00> : vector<32x8xf32>
    %162 = tpu.matmul %160, %161, %cst_63 {dimension_numbers = #tpu.dot_dimension_numbers<[1], [0], [0], [1], [0, 0, 1, 1], [], []>} : vector<32x4xf32>, vector<4x8xf32>, vector<32x8xf32> -> vector<32x8xf32>
    %163 = vector.shape_cast %162 : vector<32x8xf32> to vector<2x16x8xf32>
    %164 = vector.extract_strided_slice %1 {offsets = [8, 0], sizes = [1, 8], strides = [1, 1]} : vector<9x8xf32> to vector<1x8xf32>
    %165 = vector.shape_cast %164 : vector<1x8xf32> to vector<1x1x8xf32>
    %166 = vector.broadcast %165 : vector<1x1x8xf32> to vector<2x16x8xf32>
    %167 = arith.addf %163, %166 : vector<2x16x8xf32>
    %168 = arith.addf %159, %167 : vector<2x16x8xf32>
    %c0_64 = arith.constant 0 : index
    %c0_65 = arith.constant 0 : index
    %c0_66 = arith.constant 0 : index
    %169 = vector.load %arg11[%c0_64, %c0_65, %c0_66] : memref<2x16x8xf32, #tpu.memory_space<vmem>>, vector<2x16x8xf32>
    tpu.vector_store %arg11[%c0_64, %c0_65, %c0_66], %168 {strides = array<i32>} : memref<2x16x8xf32, #tpu.memory_space<vmem>>, vector<2x16x8xf32>,
    return
  }
  func.func @transform_0(%arg0: i32) -> (i32, i32, i32) {
    %c0_i32 = arith.constant 0 : i32
    %c0_i32_0 = arith.constant 0 : i32
    %c0_i32_1 = arith.constant 0 : i32
    return %arg0, %c0_i32, %c0_i32_0 : i32, i32, i32
  }
  func.func @transform_1(%arg0: i32) -> (i32, i32, i32) {
    %c0_i32 = arith.constant 0 : i32
    %c0_i32_0 = arith.constant 0 : i32
    %c0_i32_1 = arith.constant 0 : i32
    return %arg0, %c0_i32, %c0_i32_0 : i32, i32, i32
  }
  func.func @transform_2(%arg0: i32) -> (i32, i32, i32) {
    %c0_i32 = arith.constant 0 : i32
    %c0_i32_0 = arith.constant 0 : i32
    %c0_i32_1 = arith.constant 0 : i32
    %c0_i32_2 = arith.constant 0 : i32
    return %c0_i32, %c0_i32_0, %c0_i32_1 : i32, i32, i32
  }
  func.func @transform_3(%arg0: i32) -> (i32, i32, i32) {
    %c0_i32 = arith.constant 0 : i32
    %c0_i32_0 = arith.constant 0 : i32
    %c0_i32_1 = arith.constant 0 : i32
    %c0_i32_2 = arith.constant 0 : i32
    return %c0_i32, %c0_i32_0, %c0_i32_1 : i32, i32, i32
  }
  func.func @transform_4(%arg0: i32) -> (i32, i32) {
    %c0_i32 = arith.constant 0 : i32
    %c0_i32_0 = arith.constant 0 : i32
    %c0_i32_1 = arith.constant 0 : i32
    return %c0_i32, %c0_i32_0 : i32, i32
  }
  func.func @transform_5(%arg0: i32) -> (i32, i32) {
    %c0_i32 = arith.constant 0 : i32
    %c0_i32_0 = arith.constant 0 : i32
    %c0_i32_1 = arith.constant 0 : i32
    return %c0_i32, %c0_i32_0 : i32, i32
  }
  func.func @transform_6(%arg0: i32) -> (i32, i32) {
    %c0_i32 = arith.constant 0 : i32
    %c0_i32_0 = arith.constant 0 : i32
    %c0_i32_1 = arith.constant 0 : i32
    return %c0_i32, %c0_i32_0 : i32, i32
  }
  func.func @transform_7(%arg0: i32) -> (i32, i32) {
    %c0_i32 = arith.constant 0 : i32
    %c0_i32_0 = arith.constant 0 : i32
    %c0_i32_1 = arith.constant 0 : i32
    return %c0_i32, %c0_i32_0 : i32, i32
  }
  func.func @transform_8(%arg0: i32) -> (i32, i32) {
    %c0_i32 = arith.constant 0 : i32
    %c0_i32_0 = arith.constant 0 : i32
    %c0_i32_1 = arith.constant 0 : i32
    return %c0_i32, %c0_i32_0 : i32, i32
  }
  func.func @transform_9(%arg0: i32) -> (i32, i32) {
    %c0_i32 = arith.constant 0 : i32
    %c0_i32_0 = arith.constant 0 : i32
    %c0_i32_1 = arith.constant 0 : i32
    return %c0_i32, %c0_i32_0 : i32, i32
  }
  func.func @transform_10(%arg0: i32) -> (i32, i32, i32) {
    %c0_i32 = arith.constant 0 : i32
    %c0_i32_0 = arith.constant 0 : i32
    %c0_i32_1 = arith.constant 0 : i32
    return %arg0, %c0_i32, %c0_i32_0 : i32, i32, i32
  }
}

module attributes {stable_mosaic.version = 11 : i64} {
  func.func @_cond_res_block_kernel(%arg0: i32, %arg1: memref<2x16x4xf32, #tpu.memory_space<vmem>>, %arg2: memref<2x1x16xf32, #tpu.memory_space<vmem>>, %arg3: memref<3x4x8xf32, #tpu.memory_space<vmem>>, %arg4: memref<3x8x8xf32, #tpu.memory_space<vmem>>, %arg5: memref<16x8xf32, #tpu.memory_space<vmem>>, %arg6: memref<16x8xf32, #tpu.memory_space<vmem>>, %arg7: memref<4x8xf32, #tpu.memory_space<vmem>>, %arg8: memref<9x8xf32, #tpu.memory_space<vmem>>, %arg9: memref<8x8xf32, #tpu.memory_space<vmem>>, %arg10: memref<8x8xf32, #tpu.memory_space<vmem>>, %arg11: memref<2x16x8xf32, #tpu.memory_space<vmem>>) attributes {dimension_semantics = [#tpu.dimension_semantics<parallel>], iteration_bounds = array<i64: 1>, scalar_prefetch = 0 : i64, scratch_operands = 0 : i64, tpu.core_type = #tpu.core_type<tc>, window_params = [{transform_indices = @transform_0, window_bounds = array<i64: 2, 16, 4>}, {transform_indices = @transform_1, window_bounds = array<i64: 2, 1, 16>}, {pipeline_mode = #tpu.pipeline_mode<synchronous>, transform_indices = @transform_2, window_bounds = array<i64: 3, 4, 8>}, {pipeline_mode = #tpu.pipeline_mode<synchronous>, transform_indices = @transform_3, window_bounds = array<i64: 3, 8, 8>}, {pipeline_mode = #tpu.pipeline_mode<synchronous>, transform_indices = @transform_4, window_bounds = array<i64: 16, 8>}, {pipeline_mode = #tpu.pipeline_mode<synchronous>, transform_indices = @transform_5, window_bounds = array<i64: 16, 8>}, {pipeline_mode = #tpu.pipeline_mode<synchronous>, transform_indices = @transform_6, window_bounds = array<i64: 4, 8>}, {pipeline_mode = #tpu.pipeline_mode<synchronous>, transform_indices = @transform_7, window_bounds = array<i64: 9, 8>}, {pipeline_mode = #tpu.pipeline_mode<synchronous>, transform_indices = @transform_8, window_bounds = array<i64: 8, 8>}, {pipeline_mode = #tpu.pipeline_mode<synchronous>, transform_indices = @transform_9, window_bounds = array<i64: 8, 8>}, {transform_indices = @transform_10, window_bounds = array<i64: 2, 16, 8>}]} {
    %c0 = arith.constant 0 : index
    %c0_0 = arith.constant 0 : index
    %c0_1 = arith.constant 0 : index
    %0 = vector.load %arg1[%c0, %c0_0, %c0_1] : memref<2x16x4xf32, #tpu.memory_space<vmem>>, vector<2x16x4xf32>
    %c0_2 = arith.constant 0 : index
    %c0_3 = arith.constant 0 : index
    %1 = vector.load %arg8[%c0_2, %c0_3] : memref<9x8xf32, #tpu.memory_space<vmem>>, vector<9x8xf32>
    %c0_4 = arith.constant 0 : index
    %c0_5 = arith.constant 0 : index
    %2 = vector.load %arg9[%c0_4, %c0_5] : memref<8x8xf32, #tpu.memory_space<vmem>>, vector<8x8xf32>
    %c0_6 = arith.constant 0 : index
    %c0_7 = arith.constant 0 : index
    %3 = vector.load %arg10[%c0_6, %c0_7] : memref<8x8xf32, #tpu.memory_space<vmem>>, vector<8x8xf32>
    %4 = vector.extract_strided_slice %1 {offsets = [0, 0], sizes = [1, 8], strides = [1, 1]} : vector<9x8xf32> to vector<1x8xf32>
    %5 = vector.shape_cast %0 : vector<2x16x4xf32> to vector<32x4xf32>
    %c0_8 = arith.constant 0 : index
    %c0_9 = arith.constant 0 : index
    %c0_10 = arith.constant 0 : index
    %6 = vector.load %arg3[%c0_8, %c0_9, %c0_10] : memref<3x4x8xf32, #tpu.memory_space<vmem>>, vector<1x4x8xf32>
    %7 = vector.shape_cast %6 : vector<1x4x8xf32> to vector<4x8xf32>
    %cst = arith.constant dense<0.000000e+00> : vector<32x8xf32>
    %8 = tpu.matmul %5, %7, %cst {dimension_numbers = #tpu.dot_dimension_numbers<[1], [0], [0], [1], [0, 0, 1, 1], [], []>} : vector<32x4xf32>, vector<4x8xf32>, vector<32x8xf32> -> vector<32x8xf32>
    %9 = vector.shape_cast %8 : vector<32x8xf32> to vector<2x16x8xf32>
    %cst_11 = arith.constant 0.000000e+00 : f32
    %10 = vector.broadcast %cst_11 : f32 to vector<2x1x8xf32>
    %11 = vector.extract_strided_slice %9 {offsets = [0, 0, 0], sizes = [2, 15, 8], strides = [1, 1, 1]} : vector<2x16x8xf32> to vector<2x15x8xf32>
    %12 = tpu.concatenate %10, %11 in 1 : vector<2x1x8xf32>, vector<2x15x8xf32> -> vector<2x16x8xf32>
    %c1 = arith.constant 1 : index
    %c0_12 = arith.constant 0 : index
    %c0_13 = arith.constant 0 : index
    %13 = vector.load %arg3[%c1, %c0_12, %c0_13] : memref<3x4x8xf32, #tpu.memory_space<vmem>>, vector<1x4x8xf32>
    %14 = vector.shape_cast %13 : vector<1x4x8xf32> to vector<4x8xf32>
    %cst_14 = arith.constant dense<0.000000e+00> : vector<32x8xf32>
    %15 = tpu.matmul %5, %14, %cst_14 {dimension_numbers = #tpu.dot_dimension_numbers<[1], [0], [0], [1], [0, 0, 1, 1], [], []>} : vector<32x4xf32>, vector<4x8xf32>, vector<32x8xf32> -> vector<32x8xf32>
    %16 = vector.shape_cast %15 : vector<32x8xf32> to vector<2x16x8xf32>
    %17 = arith.addf %12, %16 : vector<2x16x8xf32>
    %c2 = arith.constant 2 : index
    %c0_15 = arith.constant 0 : index
    %c0_16 = arith.constant 0 : index
    %18 = vector.load %arg3[%c2, %c0_15, %c0_16] : memref<3x4x8xf32, #tpu.memory_space<vmem>>, vector<1x4x8xf32>
    %19 = vector.shape_cast %18 : vector<1x4x8xf32> to vector<4x8xf32>
    %cst_17 = arith.constant dense<0.000000e+00> : vector<32x8xf32>
    %20 = tpu.matmul %5, %19, %cst_17 {dimension_numbers = #tpu.dot_dimension_numbers<[1], [0], [0], [1], [0, 0, 1, 1], [], []>} : vector<32x4xf32>, vector<4x8xf32>, vector<32x8xf32> -> vector<32x8xf32>
    %21 = vector.shape_cast %20 : vector<32x8xf32> to vector<2x16x8xf32>
    %cst_18 = arith.constant 0.000000e+00 : f32
    %22 = vector.broadcast %cst_18 : f32 to vector<2x1x8xf32>
    %23 = vector.extract_strided_slice %21 {offsets = [0, 1, 0], sizes = [2, 15, 8], strides = [1, 1, 1]} : vector<2x16x8xf32> to vector<2x15x8xf32>
    %24 = tpu.concatenate %23, %22 in 1 : vector<2x15x8xf32>, vector<2x1x8xf32> -> vector<2x16x8xf32>
    %25 = arith.addf %17, %24 : vector<2x16x8xf32>
    %26 = vector.shape_cast %4 : vector<1x8xf32> to vector<1x1x8xf32>
    %27 = vector.broadcast %26 : vector<1x1x8xf32> to vector<2x16x8xf32>
    %28 = arith.addf %25, %27 : vector<2x16x8xf32>
    %29 = vector.extract_strided_slice %1 {offsets = [1, 0], sizes = [1, 8], strides = [1, 1]} : vector<9x8xf32> to vector<1x8xf32>
    %30 = vector.extract_strided_slice %1 {offsets = [2, 0], sizes = [1, 8], strides = [1, 1]} : vector<9x8xf32> to vector<1x8xf32>
    %cst_19 = arith.constant dense<0.000000e+00> : vector<2x8xf32>
    %31 = vector.multi_reduction <add>, %28, %cst_19 [1] : vector<2x16x8xf32> to vector<2x8xf32>
    %32 = arith.mulf %28, %28 : vector<2x16x8xf32>
    %cst_20 = arith.constant dense<0.000000e+00> : vector<2x8xf32>
    %33 = vector.multi_reduction <add>, %32, %cst_20 [1] : vector<2x16x8xf32> to vector<2x8xf32>
    %34 = tpu.concatenate %31, %33 in 0 : vector<2x8xf32>, vector<2x8xf32> -> vector<4x8xf32>
    %cst_21 = arith.constant dense<0.000000e+00> : vector<4x8xf32>
    %35 = tpu.matmul %34, %2, %cst_21 {dimension_numbers = #tpu.dot_dimension_numbers<[1], [0], [0], [1], [0, 0, 1, 1], [], []>} : vector<4x8xf32>, vector<8x8xf32>, vector<4x8xf32> -> vector<4x8xf32>
    %cst_22 = arith.constant dense<0.000000e+00> : vector<4x8xf32>
    %36 = tpu.matmul %35, %3, %cst_22 {dimension_numbers = #tpu.dot_dimension_numbers<[1], [0], [0], [1], [0, 0, 1, 1], [], []>} : vector<4x8xf32>, vector<8x8xf32>, vector<4x8xf32> -> vector<4x8xf32>
    %37 = vector.extract_strided_slice %36 {offsets = [0, 0], sizes = [2, 8], strides = [1, 1]} : vector<4x8xf32> to vector<2x8xf32>
    %38 = vector.extract_strided_slice %36 {offsets = [2, 0], sizes = [2, 8], strides = [1, 1]} : vector<4x8xf32> to vector<2x8xf32>
    %39 = arith.mulf %37, %37 : vector<2x8xf32>
    %40 = arith.subf %38, %39 : vector<2x8xf32>
    %cst_23 = arith.constant 9.99999974E-6 : f32
    %41 = vector.broadcast %cst_23 : f32 to vector<2x8xf32>
    %42 = arith.addf %40, %41 : vector<2x8xf32>
    %43 = math.rsqrt %42 : vector<2x8xf32>
    %44 = vector.broadcast %29 : vector<1x8xf32> to vector<2x8xf32>
    %45 = arith.mulf %43, %44 : vector<2x8xf32>
    %46 = arith.mulf %37, %45 : vector<2x8xf32>
    %47 = vector.broadcast %30 : vector<1x8xf32> to vector<2x8xf32>
    %48 = arith.subf %47, %46 : vector<2x8xf32>
    %49 = vector.shape_cast %45 : vector<2x8xf32> to vector<2x1x8xf32>
    %50 = vector.broadcast %49 : vector<2x1x8xf32> to vector<2x16x8xf32>
    %51 = arith.mulf %28, %50 : vector<2x16x8xf32>
    %52 = vector.shape_cast %48 : vector<2x8xf32> to vector<2x1x8xf32>
    %53 = vector.broadcast %52 : vector<2x1x8xf32> to vector<2x16x8xf32>
    %54 = arith.addf %51, %53 : vector<2x16x8xf32>
    %cst_24 = arith.constant 0.000000e+00 : f32
    %55 = vector.broadcast %cst_24 : f32 to vector<2x16x8xf32>
    %56 = arith.maximumf %54, %55 : vector<2x16x8xf32>
    %57 = math.absf %54 : vector<2x16x8xf32>
    %cst_25 = arith.constant 0.000000e+00 : f32
    %58 = vector.broadcast %cst_25 : f32 to vector<2x16x8xf32>
    %59 = arith.subf %58, %57 : vector<2x16x8xf32>
    %60 = math.exp %59 : vector<2x16x8xf32>
    %cst_26 = arith.constant 1.000000e+00 : f32
    %61 = vector.broadcast %cst_26 : f32 to vector<2x16x8xf32>
    %62 = arith.addf %61, %60 : vector<2x16x8xf32>
    %63 = math.log %62 : vector<2x16x8xf32>
    %64 = arith.addf %56, %63 : vector<2x16x8xf32>
    %65 = math.tanh %64 : vector<2x16x8xf32>
    %66 = arith.mulf %54, %65 : vector<2x16x8xf32>
    %c0_27 = arith.constant 0 : index
    %c0_28 = arith.constant 0 : index
    %c0_29 = arith.constant 0 : index
    %67 = vector.load %arg2[%c0_27, %c0_28, %c0_29] : memref<2x1x16xf32, #tpu.memory_space<vmem>>, vector<2x1x16xf32>
    %68 = vector.shape_cast %67 : vector<2x1x16xf32> to vector<2x16xf32>
    %cst_30 = arith.constant 0.000000e+00 : f32
    %69 = vector.broadcast %cst_30 : f32 to vector<2x16xf32>
    %70 = arith.maximumf %68, %69 : vector<2x16xf32>
    %71 = math.absf %68 : vector<2x16xf32>
    %cst_31 = arith.constant 0.000000e+00 : f32
    %72 = vector.broadcast %cst_31 : f32 to vector<2x16xf32>
    %73 = arith.subf %72, %71 : vector<2x16xf32>
    %74 = math.exp %73 : vector<2x16xf32>
    %cst_32 = arith.constant 1.000000e+00 : f32
    %75 = vector.broadcast %cst_32 : f32 to vector<2x16xf32>
    %76 = arith.addf %75, %74 : vector<2x16xf32>
    %77 = math.log %76 : vector<2x16xf32>
    %78 = arith.addf %70, %77 : vector<2x16xf32>
    %79 = math.tanh %78 : vector<2x16xf32>
    %80 = arith.mulf %68, %79 : vector<2x16xf32>
    %c0_33 = arith.constant 0 : index
    %c0_34 = arith.constant 0 : index
    %81 = vector.load %arg6[%c0_33, %c0_34] : memref<16x8xf32, #tpu.memory_space<vmem>>, vector<16x8xf32>
    %cst_35 = arith.constant dense<0.000000e+00> : vector<2x8xf32>
    %82 = tpu.matmul %80, %81, %cst_35 {dimension_numbers = #tpu.dot_dimension_numbers<[1], [0], [0], [1], [0, 0, 1, 1], [], []>} : vector<2x16xf32>, vector<16x8xf32>, vector<2x8xf32> -> vector<2x8xf32>
    %83 = vector.extract_strided_slice %1 {offsets = [6, 0], sizes = [1, 8], strides = [1, 1]} : vector<9x8xf32> to vector<1x8xf32>
    %84 = vector.broadcast %83 : vector<1x8xf32> to vector<2x8xf32>
    %85 = arith.addf %82, %84 : vector<2x8xf32>
    %c0_36 = arith.constant 0 : index
    %c0_37 = arith.constant 0 : index
    %86 = vector.load %arg5[%c0_36, %c0_37] : memref<16x8xf32, #tpu.memory_space<vmem>>, vector<16x8xf32>
    %cst_38 = arith.constant dense<0.000000e+00> : vector<2x8xf32>
    %87 = tpu.matmul %80, %86, %cst_38 {dimension_numbers = #tpu.dot_dimension_numbers<[1], [0], [0], [1], [0, 0, 1, 1], [], []>} : vector<2x16xf32>, vector<16x8xf32>, vector<2x8xf32> -> vector<2x8xf32>
    %88 = vector.extract_strided_slice %1 {offsets = [7, 0], sizes = [1, 8], strides = [1, 1]} : vector<9x8xf32> to vector<1x8xf32>
    %89 = vector.broadcast %88 : vector<1x8xf32> to vector<2x8xf32>
    %90 = arith.addf %87, %89 : vector<2x8xf32>
    %91 = vector.shape_cast %90 : vector<2x8xf32> to vector<2x1x8xf32>
    %92 = vector.broadcast %91 : vector<2x1x8xf32> to vector<2x16x8xf32>
    %93 = arith.mulf %66, %92 : vector<2x16x8xf32>
    %94 = vector.shape_cast %85 : vector<2x8xf32> to vector<2x1x8xf32>
    %95 = vector.broadcast %94 : vector<2x1x8xf32> to vector<2x16x8xf32>
    %96 = arith.addf %93, %95 : vector<2x16x8xf32>
    %97 = vector.extract_strided_slice %1 {offsets = [3, 0], sizes = [1, 8], strides = [1, 1]} : vector<9x8xf32> to vector<1x8xf32>
    %98 = vector.shape_cast %96 : vector<2x16x8xf32> to vector<32x8xf32>
    %c0_39 = arith.constant 0 : index
    %c0_40 = arith.constant 0 : index
    %c0_41 = arith.constant 0 : index
    %99 = vector.load %arg4[%c0_39, %c0_40, %c0_41] : memref<3x8x8xf32, #tpu.memory_space<vmem>>, vector<1x8x8xf32>
    %100 = vector.shape_cast %99 : vector<1x8x8xf32> to vector<8x8xf32>
    %cst_42 = arith.constant dense<0.000000e+00> : vector<32x8xf32>
    %101 = tpu.matmul %98, %100, %cst_42 {dimension_numbers = #tpu.dot_dimension_numbers<[1], [0], [0], [1], [0, 0, 1, 1], [], []>} : vector<32x8xf32>, vector<8x8xf32>, vector<32x8xf32> -> vector<32x8xf32>
    %102 = vector.shape_cast %101 : vector<32x8xf32> to vector<2x16x8xf32>
    %cst_43 = arith.constant 0.000000e+00 : f32
    %103 = vector.broadcast %cst_43 : f32 to vector<2x1x8xf32>
    %104 = vector.extract_strided_slice %102 {offsets = [0, 0, 0], sizes = [2, 15, 8], strides = [1, 1, 1]} : vector<2x16x8xf32> to vector<2x15x8xf32>
    %105 = tpu.concatenate %103, %104 in 1 : vector<2x1x8xf32>, vector<2x15x8xf32> -> vector<2x16x8xf32>
    %c1_44 = arith.constant 1 : index
    %c0_45 = arith.constant 0 : index
    %c0_46 = arith.constant 0 : index
    %106 = vector.load %arg4[%c1_44, %c0_45, %c0_46] : memref<3x8x8xf32, #tpu.memory_space<vmem>>, vector<1x8x8xf32>
    %107 = vector.shape_cast %106 : vector<1x8x8xf32> to vector<8x8xf32>
    %cst_47 = arith.constant dense<0.000000e+00> : vector<32x8xf32>
    %108 = tpu.matmul %98, %107, %cst_47 {dimension_numbers = #tpu.dot_dimension_numbers<[1], [0], [0], [1], [0, 0, 1, 1], [], []>} : vector<32x8xf32>, vector<8x8xf32>, vector<32x8xf32> -> vector<32x8xf32>
    %109 = vector.shape_cast %108 : vector<32x8xf32> to vector<2x16x8xf32>
    %110 = arith.addf %105, %109 : vector<2x16x8xf32>
    %c2_48 = arith.constant 2 : index
    %c0_49 = arith.constant 0 : index
    %c0_50 = arith.constant 0 : index
    %111 = vector.load %arg4[%c2_48, %c0_49, %c0_50] : memref<3x8x8xf32, #tpu.memory_space<vmem>>, vector<1x8x8xf32>
    %112 = vector.shape_cast %111 : vector<1x8x8xf32> to vector<8x8xf32>
    %cst_51 = arith.constant dense<0.000000e+00> : vector<32x8xf32>
    %113 = tpu.matmul %98, %112, %cst_51 {dimension_numbers = #tpu.dot_dimension_numbers<[1], [0], [0], [1], [0, 0, 1, 1], [], []>} : vector<32x8xf32>, vector<8x8xf32>, vector<32x8xf32> -> vector<32x8xf32>
    %114 = vector.shape_cast %113 : vector<32x8xf32> to vector<2x16x8xf32>
    %cst_52 = arith.constant 0.000000e+00 : f32
    %115 = vector.broadcast %cst_52 : f32 to vector<2x1x8xf32>
    %116 = vector.extract_strided_slice %114 {offsets = [0, 1, 0], sizes = [2, 15, 8], strides = [1, 1, 1]} : vector<2x16x8xf32> to vector<2x15x8xf32>
    %117 = tpu.concatenate %116, %115 in 1 : vector<2x15x8xf32>, vector<2x1x8xf32> -> vector<2x16x8xf32>
    %118 = arith.addf %110, %117 : vector<2x16x8xf32>
    %119 = vector.shape_cast %97 : vector<1x8xf32> to vector<1x1x8xf32>
    %120 = vector.broadcast %119 : vector<1x1x8xf32> to vector<2x16x8xf32>
    %121 = arith.addf %118, %120 : vector<2x16x8xf32>
    %122 = vector.extract_strided_slice %1 {offsets = [4, 0], sizes = [1, 8], strides = [1, 1]} : vector<9x8xf32> to vector<1x8xf32>
    %123 = vector.extract_strided_slice %1 {offsets = [5, 0], sizes = [1, 8], strides = [1, 1]} : vector<9x8xf32> to vector<1x8xf32>
    %cst_53 = arith.constant dense<0.000000e+00> : vector<2x8xf32>
    %124 = vector.multi_reduction <add>, %121, %cst_53 [1] : vector<2x16x8xf32> to vector<2x8xf32>
    %125 = arith.mulf %121, %121 : vector<2x16x8xf32>
    %cst_54 = arith.constant dense<0.000000e+00> : vector<2x8xf32>
    %126 = vector.multi_reduction <add>, %125, %cst_54 [1] : vector<2x16x8xf32> to vector<2x8xf32>
    %127 = tpu.concatenate %124, %126 in 0 : vector<2x8xf32>, vector<2x8xf32> -> vector<4x8xf32>
    %cst_55 = arith.constant dense<0.000000e+00> : vector<4x8xf32>
    %128 = tpu.matmul %127, %2, %cst_55 {dimension_numbers = #tpu.dot_dimension_numbers<[1], [0], [0], [1], [0, 0, 1, 1], [], []>} : vector<4x8xf32>, vector<8x8xf32>, vector<4x8xf32> -> vector<4x8xf32>
    %cst_56 = arith.constant dense<0.000000e+00> : vector<4x8xf32>
    %129 = tpu.matmul %128, %3, %cst_56 {dimension_numbers = #tpu.dot_dimension_numbers<[1], [0], [0], [1], [0, 0, 1, 1], [], []>} : vector<4x8xf32>, vector<8x8xf32>, vector<4x8xf32> -> vector<4x8xf32>
    %130 = vector.extract_strided_slice %129 {offsets = [0, 0], sizes = [2, 8], strides = [1, 1]} : vector<4x8xf32> to vector<2x8xf32>
    %131 = vector.extract_strided_slice %129 {offsets = [2, 0], sizes = [2, 8], strides = [1, 1]} : vector<4x8xf32> to vector<2x8xf32>
    %132 = arith.mulf %130, %130 : vector<2x8xf32>
    %133 = arith.subf %131, %132 : vector<2x8xf32>
    %cst_57 = arith.constant 9.99999974E-6 : f32
    %134 = vector.broadcast %cst_57 : f32 to vector<2x8xf32>
    %135 = arith.addf %133, %134 : vector<2x8xf32>
    %136 = math.rsqrt %135 : vector<2x8xf32>
    %137 = vector.broadcast %122 : vector<1x8xf32> to vector<2x8xf32>
    %138 = arith.mulf %136, %137 : vector<2x8xf32>
    %139 = arith.mulf %130, %138 : vector<2x8xf32>
    %140 = vector.broadcast %123 : vector<1x8xf32> to vector<2x8xf32>
    %141 = arith.subf %140, %139 : vector<2x8xf32>
    %142 = vector.shape_cast %138 : vector<2x8xf32> to vector<2x1x8xf32>
    %143 = vector.broadcast %142 : vector<2x1x8xf32> to vector<2x16x8xf32>
    %144 = arith.mulf %121, %143 : vector<2x16x8xf32>
    %145 = vector.shape_cast %141 : vector<2x8xf32> to vector<2x1x8xf32>
    %146 = vector.broadcast %145 : vector<2x1x8xf32> to vector<2x16x8xf32>
    %147 = arith.addf %144, %146 : vector<2x16x8xf32>
    %cst_58 = arith.constant 0.000000e+00 : f32
    %148 = vector.broadcast %cst_58 : f32 to vector<2x16x8xf32>
    %149 = arith.maximumf %147, %148 : vector<2x16x8xf32>
    %150 = math.absf %147 : vector<2x16x8xf32>
    %cst_59 = arith.constant 0.000000e+00 : f32
    %151 = vector.broadcast %cst_59 : f32 to vector<2x16x8xf32>
    %152 = arith.subf %151, %150 : vector<2x16x8xf32>
    %153 = math.exp %152 : vector<2x16x8xf32>
    %cst_60 = arith.constant 1.000000e+00 : f32
    %154 = vector.broadcast %cst_60 : f32 to vector<2x16x8xf32>
    %155 = arith.addf %154, %153 : vector<2x16x8xf32>
    %156 = math.log %155 : vector<2x16x8xf32>
    %157 = arith.addf %149, %156 : vector<2x16x8xf32>
    %158 = math.tanh %157 : vector<2x16x8xf32>
    %159 = arith.mulf %147, %158 : vector<2x16x8xf32>
    %160 = vector.shape_cast %0 : vector<2x16x4xf32> to vector<32x4xf32>
    %c0_61 = arith.constant 0 : index
    %c0_62 = arith.constant 0 : index
    %161 = vector.load %arg7[%c0_61, %c0_62] : memref<4x8xf32, #tpu.memory_space<vmem>>, vector<4x8xf32>
    %cst_63 = arith.constant dense<0.000000e+00> : vector<32x8xf32>
    %162 = tpu.matmul %160, %161, %cst_63 {dimension_numbers = #tpu.dot_dimension_numbers<[1], [0], [0], [1], [0, 0, 1, 1], [], []>} : vector<32x4xf32>, vector<4x8xf32>, vector<32x8xf32> -> vector<32x8xf32>
    %163 = vector.shape_cast %162 : vector<32x8xf32> to vector<2x16x8xf32>
    %164 = vector.extract_strided_slice %1 {offsets = [8, 0], sizes = [1, 8], strides = [1, 1]} : vector<9x8xf32> to vector<1x8xf32>
    %165 = vector.shape_cast %164 : vector<1x8xf32> to vector<1x1x8xf32>
    %166 = vector.broadcast %165 : vector<1x1x8xf32> to vector<2x16x8xf32>
    %167 = arith.addf %163, %166 : vector<2x16x8xf32>
    %168 = arith.addf %159, %167 : vector<2x16x8xf32>
    %c0_64 = arith.constant 0 : index
    %c0_65 = arith.constant 0 : index
    %c0_66 = arith.constant 0 : index
    %169 = vector.load %arg11[%c0_64, %c0_65, %c0_66] : memref<2x16x8xf32, #tpu.memory_space<vmem>>, vector<2x16x8xf32>
    tpu.vector_store %arg11[%c0_64, %c0_65, %c0_66], %168 {strides = array<i32>} : memref<2x16x8xf32, #tpu.memory_space<vmem>>, vector<2x16x8xf32>,
    return
  }
  func.func @transform_0(%arg0: i32) -> (i32, i32, i32) {
    %c0_i32 = arith.constant 0 : i32
    %c0_i32_0 = arith.constant 0 : i32
    %c0_i32_1 = arith.constant 0 : i32
    return %arg0, %c0_i32, %c0_i32_0 : i32, i32, i32
  }
  func.func @transform_1(%arg0: i32) -> (i32, i32, i32) {
    %c0_i32 = arith.constant 0 : i32
    %c0_i32_0 = arith.constant 0 : i32
    %c0_i32_1 = arith.constant 0 : i32
    return %arg0, %c0_i32, %c0_i32_0 : i32, i32, i32
  }
  func.func @transform_2(%arg0: i32) -> (i32, i32, i32) {
    %c0_i32 = arith.constant 0 : i32
    %c0_i32_0 = arith.constant 0 : i32
    %c0_i32_1 = arith.constant 0 : i32
    %c0_i32_2 = arith.constant 0 : i32
    return %c0_i32, %c0_i32_0, %c0_i32_1 : i32, i32, i32
  }
  func.func @transform_3(%arg0: i32) -> (i32, i32, i32) {
    %c0_i32 = arith.constant 0 : i32
    %c0_i32_0 = arith.constant 0 : i32
    %c0_i32_1 = arith.constant 0 : i32
    %c0_i32_2 = arith.constant 0 : i32
    return %c0_i32, %c0_i32_0, %c0_i32_1 : i32, i32, i32
  }
  func.func @transform_4(%arg0: i32) -> (i32, i32) {
    %c0_i32 = arith.constant 0 : i32
    %c0_i32_0 = arith.constant 0 : i32
    %c0_i32_1 = arith.constant 0 : i32
    return %c0_i32, %c0_i32_0 : i32, i32
  }
  func.func @transform_5(%arg0: i32) -> (i32, i32) {
    %c0_i32 = arith.constant 0 : i32
    %c0_i32_0 = arith.constant 0 : i32
    %c0_i32_1 = arith.constant 0 : i32
    return %c0_i32, %c0_i32_0 : i32, i32
  }
  func.func @transform_6(%arg0: i32) -> (i32, i32) {
    %c0_i32 = arith.constant 0 : i32
    %c0_i32_0 = arith.constant 0 : i32
    %c0_i32_1 = arith.constant 0 : i32
    return %c0_i32, %c0_i32_0 : i32, i32
  }
  func.func @transform_7(%arg0: i32) -> (i32, i32) {
    %c0_i32 = arith.constant 0 : i32
    %c0_i32_0 = arith.constant 0 : i32
    %c0_i32_1 = arith.constant 0 : i32
    return %c0_i32, %c0_i32_0 : i32, i32
  }
  func.func @transform_8(%arg0: i32) -> (i32, i32) {
    %c0_i32 = arith.constant 0 : i32
    %c0_i32_0 = arith.constant 0 : i32
    %c0_i32_1 = arith.constant 0 : i32
    return %c0_i32, %c0_i32_0 : i32, i32
  }
  func.func @transform_9(%arg0: i32) -> (i32, i32) {
    %c0_i32 = arith.constant 0 : i32
    %c0_i32_0 = arith.constant 0 : i32
    %c0_i32_1 = arith.constant 0 : i32
    return %c0_i32, %c0_i32_0 : i32, i32
  }
  func.func @transform_10(%arg0: i32) -> (i32, i32, i32) {
    %c0_i32 = arith.constant 0 : i32
    %c0_i32_0 = arith.constant 0 : i32
    %c0_i32_1 = arith.constant 0 : i32
    return %arg0, %c0_i32, %c0_i32_0 : i32, i32, i32
  }
}

</mosaic_0001>

<bundles_post_ra>
// kernel: tpu_custom_call.1
= control target key start
LH: loop header
LB: loop body
LE: loop exit
PB: predicated region body
PF: predicated region fallthrough
CT: control target
= control target key end

     0   :  { %vm57_vm0 = vcmask 1043456   ;;  %vm44_vm1 = vcmask 31744   ;;  %v2007_v7 = vmov 0.0   ;;  %vm2008_vm2 = vmmov 0   ;;  %s2426_s2 = inlined_call_operand.vmem [shape: f32[3,4,8], index: 2, kind: input, shape index: {}]   ;;  %s2427_s0 = inlined_call_operand.vmem [shape: f32[2,16,4], index: 0, kind: input, shape index: {}]   ;;  %s2428_s8 = inlined_call_operand.vmem [shape: f32[8,8], index: 8, kind: input, shape index: {}]   ;;  %s2429_s7 = inlined_call_operand.vmem [shape: f32[9,8], index: 7, kind: input, shape index: {}]   ;;  %s2430_s9 = inlined_call_operand.vmem [shape: f32[8,8], index: 9, kind: input, shape index: {}]   ;;  %s2431_s5 = inlined_call_operand.vmem [shape: f32[16,8], index: 5, kind: input, shape index: {}]   ;;  %s2432_s1 = inlined_call_operand.vmem [shape: f32[2,1,16], index: 1, kind: input, shape index: {}]   ;;  %s2433_s4 = inlined_call_operand.vmem [shape: f32[16,8], index: 4, kind: input, shape index: {}]   ;;  %s2434_s3 = inlined_call_operand.vmem [shape: f32[3,8,8], index: 3, kind: input, shape index: {}]   ;;  %s2435_s6 = inlined_call_operand.vmem [shape: f32[4,8], index: 6, kind: input, shape index: {}]   ;;  %s2436_s10 = inlined_call_operand.vmem [shape: f32[2,16,8], index: 10, kind: output, shape index: {}]  }
   0x1   :  { %v43_v0 = vld [vmem:[%s2426_s2] sm:$0xf]  ;;  %v2077_v2 = vld [vmem:[%s2427_s0 + $0x10] sm:$0xff]  ;;  %v2084_v3 = vld [vmem:[%s2427_s0 + $0x8] sm:$0xff]  ;;  %v368_v9 = vlaneseq  ;;  %vm150_vm3 = vcmask 1040384   ;;  %vm351_vm4 = vcmask 1046528  }
   0x2   :  { %v2072_v1 = vld [vmem:[%s2427_s0] sm:$0xff]  ;;  %1841 = vmatprep.subr.msk.mxu0 %vm57_vm0, %v43_v0  ;;  %1937 = vmatprep.subr.msk.mxu1 %vm57_vm0, %v43_v0  ;;  %v2089_v4 = vld [vmem:[%s2427_s0 + $0x18] sm:$0xff]  ;;  %v1760_v5 = vld [vmem:[%s2426_s2 + $0x8] sm:$0xf]  ;;  %vm376_vm5 = vcmask 64512   ;;  %vm419_vm6 = vcmask 1041409  }
   0x3   :  { %1842 = vmatpush3.msk.msra.mxu0 %vm57_vm0, %v43_v0  ;;  %1938 = vmatpush3.msk.msra.mxu1 %vm57_vm0, %v43_v0  ;;  %v1754_v6 = vld [vmem:[%s2426_s2 + $0x4] sm:$0xf]  ;;  %v2139_v10 = vshrl.u32 %v368_v9, 7  ;;  %vm424_vm7 = vcmask 1043459   ;;  %vm427_vm8 = vcmask 1041408   ;;  %vm762_vm9 = vcmask 130048  }
   0x4   :  { %1843 = vmatprep.mubr.msk.f32.mxu0 %vm44_vm1, %v2072_v1  ;;  %1846 = vmatprep.mubr.msk.f32.mxu1 %vm44_vm1, %v2077_v2  ;;  %v2131_v8 = vld [vmem:[%s2428_s8] sm:$0xff] }
   0x5   :  { %1844 = vmatmul.mubr.msk.f32.vlgmr.msra.gmra.mrb[0].mxu0 %vm44_vm1, %v2084_v3  ;;  %1847 = vmatmul.mubr.msk.f32.vlgmr.msra.gmra.mrb[0].mxu1 %vm44_vm1, %v2089_v4  ;;  %v2142_v19 = vsub.s32 0, %v2139_v10  ;;  %v2147_v20 = vld [vmem:[%s2429_s7] sm:$0xff] }
   0x6   :  { %1857 = vmatprep.subr.msk.mxu0 %vm57_vm0, %v1760_v5  ;;  %1849 = vmatprep.subr.msk.mxu1 %vm57_vm0, %v1754_v6 }
   0x7   :  { %1858 = vmatpush3.msk.msra.mxu0 %vm57_vm0, %v1760_v5  ;;  %1850 = vmatpush3.msk.msra.mxu1 %vm57_vm0, %v1754_v6  ;;  %v371_v30 = vrot.slane %v2147_v20, %v2142_v19 }
   0x8   :  { %1851 = vmatprep.mubr.msk.f32.mxu1 %vm44_vm1, %v2072_v1  ;;  %1859 = vmatprep.mubr.msk.f32.mxu0 %vm44_vm1, %v2072_v1 }
   0x9   :  { %1852 = vmatmul.mubr.msk.f32.vlgmr.msra.gmra.mrb[2].mxu1 %vm44_vm1, %v2084_v3  ;;  %1860 = vmatmul.mubr.msk.f32.vlgmr.msra.gmra.mrb[2].mxu0 %vm44_vm1, %v2084_v3 }
   0xa   :  { %1854 = vmatprep.mubr.msk.f32.mxu1 %vm44_vm1, %v2077_v2  ;;  %1862 = vmatprep.mubr.msk.f32.mxu0 %vm44_vm1, %v2077_v2 }
   0xb   :  { %1865 = vmatprep.subr.mxu1 %v2007_v7 }
   0xc   :  { %1866 = vmatpush3.msra.mxu1 %v2131_v8 }
   0xd   :  { %1855 = vmatmul.mubr.msk.f32.gmra.mrb[4].mxu1 %vm44_vm1, %v2089_v4  ;;  %1863 = vmatmul.mubr.msk.f32.gmra.mrb[4].mxu0 %vm44_vm1, %v2089_v4 }
   0xe   :  { %1867 = vmatprep.mubr.msk.f32.mxu1 %vm2008_vm2, %v2007_v7  ;;  %1879 = vmatprep.mubr.msk.f32.mxu0 %vm2008_vm2, %v2007_v7 }
   0xf   :  { %1870 = vmatprep.subr.mxu1 %v2007_v7 }
  0xd8   :  { %v1845_v11 = vpop.f32.mrb[0].mxu0  ;;  %v1848_v12 = vpop.f32.mrb[0].mxu1 }
  0xd9   :  { %v152_v13 = vrot.slane %v1845_v11, 7  ;;  %v127_v14 = vpop.f32.mrb[1].mxu0  ;;  %v155_v15 = vrot.slane %v1848_v12, 7  ;;  %v137_v16 = vpop.f32.mrb[1].mxu1 }
  0xda   :  { %v151_v17 = vrot.slane %v127_v14, 7  ;;  %v154_v18 = vrot.slane %v137_v16, 7 }
  0xdc   :  { %v153_v21 = vsel %vm150_vm3, %v151_v17, %v152_v13  ;;  %v1853_v22 = vpop.f32.mrb[2].mxu1  ;;  %v1861_v23 = vpop.f32.mrb[2].mxu0  ;;  %v161_v24 = vsel %vm150_vm3, 0.0, %v151_v17  ;;  %v156_v25 = vsel %vm150_vm3, %v154_v18, %v155_v15  ;;  %v162_v41 = vsel %vm150_vm3, 0.0, %v154_v18 }
  0xdd   :  { %v254_v26 = vadd.f32 %v1853_v22, %v153_v21  ;;  %v353_v27 = vrot.slane %v1861_v23, 1  ;;  %v234_v28 = vpop.f32.mrb[3].mxu1  ;;  %v328_v29 = vpop.f32.mrb[3].mxu0 }
  0xde   :  { %v253_v31 = vadd.f32 %v234_v28, %v161_v24  ;;  %v352_v32 = vrot.slane %v328_v29, 1 }
  0xdf   :  { %v362_v33 = vsel %vm351_vm4, %v353_v27, 0.0 }
  0xe0   :  { %v365_v34 = vadd.f32 %v362_v33, %v254_v26  ;;  %v354_v35 = vsel %vm351_vm4, %v352_v32, %v353_v27  ;;  %v1856_v36 = vpop.f32.mrb[4].mxu1  ;;  %v1864_v37 = vpop.f32.mrb[4].mxu0 }
  0xe1   :  { %v364_v38 = vadd.f32 %v354_v35, %v253_v31  ;;  %v256_v39 = vadd.f32 %v1856_v36, %v156_v25  ;;  %v356_v40 = vrot.slane %v1864_v37, 1  ;;  %v244_v42 = vpop.f32.mrb[5].mxu1  ;;  %v338_v43 = vpop.f32.mrb[5].mxu0 }
  0xe2   :  { %v2157_v44 = vadd.f32 %v371_v30, %v365_v34  ;;  %v255_v45 = vadd.f32 %v244_v42, %v162_v41  ;;  %v355_v46 = vrot.slane %v338_v43, 1  ;;  %v2192_v41 = vld [vmem:[%s2430_s9] sm:$0xff]  ;;  %v2009_v43 = vmov 0.0|0.0  }
  0xe3   :  { %v2159_v47 = vadd.f32 %v371_v30, %v364_v38  ;;  %v363_v48 = vsel %vm351_vm4, %v356_v40, 0.0  ;;  %1931 = vmatprep.subr.bf16.mxu0 %v2009_v43 }
  0xe4   :  { %v378_v49 = vsel %vm376_vm5, %v2157_v44, 0.0  ;;  %v396_v50 = vmul.f32 %v2157_v44, %v2157_v44  ;;  %v367_v51 = vadd.f32 %v363_v48, %v256_v39  ;;  %v357_v52 = vsel %vm351_vm4, %v355_v46, %v356_v40  ;;  %v740_v46 = vld [vmem:[%s2431_s5 + $0x8] sm:$0xff] }
  0xe5   :  { %v377_v53 = vsel %vm376_vm5, %v2159_v47, 0.0  ;;  %v395_v54 = vmul.f32 %v2159_v47, %v2159_v47  ;;  %v366_v55 = vadd.f32 %v357_v52, %v255_v45  ;;  %v739_v45 = vld [vmem:[%s2431_s5] sm:$0xff] }
  0xe6   :  { %v400_v56 = vsel %vm376_vm5, %v396_v50, 0.0  ;;  %v379_v57 = vadd.f32 %v378_v49, %v377_v53  ;;  %v2172_v58 = vadd.f32 %v371_v30, %v367_v51  ;;  %v1932_v48 = vpack.c.bf16 %v740_v46, %v739_v45  ;;  %v715_v49 = vld [vmem:[%s2432_s1] sm:$0x1]  ;;  %v716_v50 = vld [vmem:[%s2432_s1 + $0x1] sm:$0x1] }
  0xe7   :  { %v399_v59 = vsel %vm376_vm5, %v395_v54, 0.0  ;;  %v2175_v60 = vadd.f32 %v371_v30, %v366_v55  ;;  %v719_v51 = vand.u32 2147483647, %v715_v49  ;;  %v720_v52 = vand.u32 2147483647, %v716_v50 }
  0xe8   :  { %v380_v61 = vrot.slane %v379_v57, 4  ;;  %v401_v62 = vadd.f32 %v400_v56, %v399_v59  ;;  %v387_v63 = vsel %vm376_vm5, %v2172_v58, 0.0  ;;  %v398_v0 = vmul.f32 %v2172_v58, %v2172_v58  ;;  %1933 = vmatpush3.bf16.msra.mxu0 %v1932_v48 }
  0xe9   :  { %v386_v5 = vsel %vm376_vm5, %v2175_v60, 0.0  ;;  %v397_v6 = vmul.f32 %v2175_v60, %v2175_v60  ;;  %v721_v53 = vsub.f32 0.0, %v719_v51  ;;  %v722_v54 = vsub.f32 0.0, %v720_v52 }
  0xea   :  { %v381_v9 = vadd.f32 %v380_v61, %v379_v57  ;;  %v402_v11 = vrot.slane %v401_v62, 4  ;;  %v409_v12 = vsel %vm376_vm5, %v398_v0, 0.0  ;;  %v388_v13 = vadd.f32 %v387_v63, %v386_v5 }
  0xeb   :  { %v408_v14 = vsel %vm376_vm5, %v397_v6, 0.0  ;;  %v723_v55 = vmul.f32 1.442695, %v721_v53  ;;  %v725_v56 = vmul.f32 1.442695, %v722_v54  ;;  %v717_v63 = vmax.f32 %v715_v49, 0.0 }
  0xec   :  { %v382_v15 = vrot.slane %v381_v9, 2  ;;  %v403_v16 = vadd.f32 %v402_v11, %v401_v62  ;;  %v389_v17 = vrot.slane %v388_v13, 4  ;;  %v410_v18 = vadd.f32 %v409_v12, %v408_v14 }
  0xed   :  { %1943 = vpow2.f32 %v723_v55  ;;  %v718_v5 = vmax.f32 %v716_v50, 0.0  ;;  %v2010_v14 = vmov 1966171168   ;;  %v584_v48 = vsub.s32 1, %v2139_v10 }
  0xee   :  { %v390_v21 = vadd.f32 %v389_v17, %v388_v13  ;;  %v411_v22 = vrot.slane %v410_v18, 4  ;;  %v404_v23 = vrot.slane %v403_v16, 2  ;;  %v383_v26 = vadd.f32 %v382_v15, %v381_v9 }
  0xef   :  { %1945 = vpow2.f32 %v725_v56  ;;  %v597_v15 = vunpack.c.l.s4 %v2010_v14 }
  0xf0   :  { %v391_v24 = vrot.slane %v390_v21, 2  ;;  %v412_v25 = vadd.f32 %v411_v22, %v410_v18  ;;  %v405_v27 = vadd.f32 %v404_v23, %v403_v16  ;;  %v384_v30 = vrot.slane %v383_v26, 1 }
  0xf1   :  { %v598_v16 = vunpack.c.0.s8 %v597_v15 }
  0xf2   :  { %v392_v28 = vadd.f32 %v391_v24, %v390_v21  ;;  %v413_v29 = vrot.slane %v412_v25, 2  ;;  %v406_v32 = vrot.slane %v405_v27, 1  ;;  %v385_v36 = vadd.f32 %v384_v30, %v383_v26 }
  0xf3   :  { %v2212_v22 = vsub.s32 %v598_v16, %v2139_v10 }
  0xf4   :  { %v393_v31 = vrot.slane %v392_v28, 1  ;;  %v414_v33 = vadd.f32 %v413_v29, %v412_v25  ;;  %v407_v37 = vadd.f32 %v406_v32, %v405_v27  ;;  %v835_v27 = vld [vmem:[%s2433_s4] sm:$0xff] }
  0xf6   :  { %v394_v34 = vadd.f32 %v393_v31, %v392_v28  ;;  %v415_v35 = vrot.slane %v414_v33, 1  ;;  %v836_v28 = vld [vmem:[%s2433_s4 + $0x8] sm:$0xff] }
  0xf7   :  { %v1944_v57 = vpop.eup %1943  ;;  %v1935_v29 = vpack.c.bf16 %v836_v28, %v835_v27 }
  0xf8   :  { %v416_v38 = vadd.f32 %v415_v35, %v414_v33  ;;  %v420_v39 = vsel %vm419_vm6, %v394_v34, %v385_v36  ;;  %v727_v61 = vadd.f32 1.0, %v1944_v57  ;;  %v985_v34 = vld [vmem:[%s2434_s3] sm:$0xff]  ;;  %v1774_v35 = vld [vmem:[%s2434_s3 + $0x8] sm:$0xff]  ;;  %v2236_v36 = vld [vmem:[%s2434_s3 + $0x10] sm:$0xff] }
  0xf9   :  { %v1946_v59 = vpop.eup %1945  ;;  %1889 = vmatprep.subr.mxu0 %v985_v34 }
  0xfa   :  { %v425_v40 = vsel %vm424_vm7, %v416_v38, %v407_v37  ;;  %v728_v62 = vadd.f32 1.0, %v1946_v59  ;;  %1947 = vlog2.f32 %v727_v61 }
  0xfb   :  { %v428_v42 = vsel %vm427_vm8, %v420_v39, %v425_v40 }
  0xfc   :  { %1868 = vmatmul.mubr.msk.f32.vlgmr.msra.gmra.mrb[6].mxu1 %vm376_vm5, %v428_v42  ;;  %1949 = vlog2.f32 %v728_v62 }
  0xfd   :  { %1871 = vmatpush3.msra.mxu1 %v2192_v41  ;;  %1872 = vmatprep.mubr.msk.f32.mxu1 %vm2008_vm2, %v2007_v7 }
  0xfe   :  { %1934 = vmatprep.subr.bf16.mxu1 %v2009_v43 }
 0x104   :  { %v1948_v0 = vpop.eup %1947 }
 0x105   :  { %v730_v9 = vmul.f32 0.6931472, %v1948_v0 }
 0x106   :  { %v1950_v6 = vpop.eup %1949 }
 0x107   :  { %v732_v11 = vmul.f32 0.6931472, %v1950_v6  ;;  %v733_v12 = vadd.f32 %v730_v9, %v717_v63 }
 0x109   :  { %v734_v13 = vadd.f32 %v732_v11, %v718_v5  ;;  %1951 = vtanh.f32 %v733_v12 }
 0x10b   :  { %1953 = vtanh.f32 %v734_v13 }
 0x113   :  { %v1952_v17 = vpop.eup %1951 }
 0x114   :  { %v737_v21 = vmul.f32 %v1952_v17, %v715_v49  ;;  %v585_v49 = vrot.slane %v2147_v20, %v584_v48 }
 0x115   :  { %v1954_v18 = vpop.eup %1953 }
 0x116   :  { %v738_v23 = vmul.f32 %v1954_v18, %v716_v50  ;;  %v593_v50 = vsub.s32 2, %v2139_v10 }
 0x118   :  { %v747_v24 = vcombine.low %v737_v21, %v738_v23  ;;  %v594_v54 = vrot.slane %v2147_v20, %v593_v50  ;;  %v743_v50 = vsub.s32 6, %v2139_v10 }
 0x11a   :  { %v754_v25 = vrot.slane %v747_v24, %v2212_v22 }
 0x11c   :  { %v761_v26 = vrot.slane %v754_v25, %v2212_v22 }
 0x11e   :  { %1880 = vmatmul.mubr.msk.f32.vlgmr.msra.gmra.mrb[6].mxu0 %vm762_vm9, %v761_v26 }
 0x11f   :  { %1890 = vmatpush3.msra.mxu0 %v985_v34 }
 0x120   :  { %1905 = vmatprep.subr.mxu0 %v2236_v36 }
 0x1cf   :  { %v498_v30 = vpop.f32.mrb[6].mxu1 }
 0x1d0   :  { %v1869_v31 = vpop.f32.mrb[7].mxu1  ;;  %1873 = vmatmul.mubr.msk.f32.vlgmr.msra.gmra.mrb[8].mxu1 %vm376_vm5, %v498_v30 }
 0x1d1   :  { %1936 = vmatpush3.bf16.msra.mxu1 %v1935_v29  ;;  %1886 = vmatprep.mubr.msk.f32.mxu1 %vm2008_vm2, %v2007_v7 }
 0x1d2   :  { %1897 = vmatprep.subr.mxu1 %v1774_v35 }
 0x1d4   :  { %1887 = vmatmul.mubr.msk.f32.vlgmr.msra.gmra.mrb[10].mxu1 %vm762_vm9, %v761_v26 }
 0x1d5   :  { %1898 = vmatpush3.msra.mxu1 %v1774_v35 }
 0x1d6   :  { %1913 = vmatprep.subr.mxu1 %v2007_v7 }
 0x1f1   :  { %v2225_v32 = vpop.f32.mrb[6].mxu0 }
 0x1f2   :  { %v1881_v33 = vpop.f32.mrb[7].mxu0 }
 0x2a3   :  { %v571_v37 = vpop.f32.mrb[8].mxu1 }
 0x2a4   :  { %v575_v38 = vmul.f32 %v571_v37, %v571_v37  ;;  %v1874_v39 = vpop.f32.mrb[9].mxu1 }
 0x2a6   :  { %v577_v40 = vrot.slane %v575_v38, 6 }
 0x2a7   :  { %v2240_v42 = vpop.f32.mrb[10].mxu1 }
 0x2a8   :  { %v579_v43 = vsub.f32 %v571_v37, %v577_v40  ;;  %v1888_v45 = vpop.f32.mrb[11].mxu1 }
 0x2aa   :  { %v580_v46 = vadd.f32 1e-05, %v579_v43 }
 0x2ac   :  { %1955 = vrsqrt.f32 %v580_v46 }
 0x2b6   :  { %v1956_v51 = vpop.eup %1955 }
 0x2b7   :  { %v586_v52 = vmul.f32 %v1956_v51, %v585_v49  ;;  %v839_v49 = vsub.s32 7, %v2139_v10 }
 0x2b9   :  { %v588_v53 = vrot.slane %v586_v52, 2  ;;  %v602_v55 = vrot.slane %v586_v52, %v2212_v22  ;;  %v840_v51 = vrot.slane %v2147_v20, %v839_v49  ;;  %v744_v52 = vrot.slane %v2147_v20, %v743_v50 }
 0x2bb   :  { %v590_v56 = vmul.f32 %v588_v53, %v571_v37  ;;  %v603_v57 = vcombine.high %v602_v55, %v602_v55  ;;  %v610_v59 = vrot.slane %v602_v55, %v2212_v22 }
 0x2bd   :  { %v595_v61 = vsub.f32 %v594_v54, %v590_v56  ;;  %v617_v62 = vrot.slane %v603_v57, %v2212_v22  ;;  %v618_v63 = vcombine.high %v610_v59, %v610_v59  ;;  %v908_v54 = vadd.f32 %v2240_v42, %v840_v51 }
 0x2bf   :  { %v619_v0 = vcombine.high %v617_v62, %v617_v62  ;;  %v641_v5 = vrot.slane %v595_v61, %v2212_v22  ;;  %v623_v6 = vrot.slane %v618_v63, %v2142_v19  ;;  %v832_v63 = vadd.f32 %v2225_v32, %v744_v52 }
 0x2c0   :  { %v918_v42 = vrot.slane %v908_v54, %v2212_v22 }
 0x2c1   :  { %v627_v9 = vrot.slane %v619_v0, %v2142_v19  ;;  %v642_v11 = vcombine.high %v641_v5, %v641_v5  ;;  %v649_v12 = vrot.slane %v641_v5, %v2212_v22  ;;  %v630_v14 = vmul.f32 %v623_v6, %v2159_v47 }
 0x2c2   :  { %v631_v15 = vmul.f32 %v623_v6, %v2157_v44  ;;  %v926_v32 = vrot.slane %v918_v42, %v2212_v22 }
 0x2c3   :  { %v656_v13 = vrot.slane %v642_v11, %v2212_v22  ;;  %v660_v16 = vrot.slane %v649_v12, %v2142_v19  ;;  %v632_v17 = vmul.f32 %v627_v9, %v2175_v60  ;;  %v633_v18 = vmul.f32 %v627_v9, %v2172_v58 }
 0x2c5   :  { %v664_v21 = vrot.slane %v656_v13, %v2142_v19  ;;  %v2260_v23 = vadd.f32 %v660_v16, %v630_v14  ;;  %v2262_v24 = vadd.f32 %v660_v16, %v631_v15  ;;  %v955_v16 = vrot.slane %v832_v63, %v2212_v22 }
 0x2c7   :  { %v2264_v25 = vadd.f32 %v664_v21, %v632_v17  ;;  %v2266_v26 = vadd.f32 %v664_v21, %v633_v18  ;;  %v675_v47 = vand.u32 2147483647, %v2260_v23  ;;  %v676_v44 = vand.u32 2147483647, %v2262_v24 }
 0x2c8   :  { %v671_v56 = vmax.f32 %v2260_v23, 0.0  ;;  %v672_v61 = vmax.f32 %v2262_v24, 0.0  ;;  %v919_v17 = vcombine.high %v918_v42, %v918_v42  ;;  %v956_v18 = vcombine.high %v955_v16, %v955_v16 }
 0x2c9   :  { %v677_v27 = vand.u32 2147483647, %v2264_v25  ;;  %v678_v60 = vand.u32 2147483647, %v2266_v26  ;;  %v679_v28 = vsub.f32 0.0, %v675_v47  ;;  %v680_v58 = vsub.f32 0.0, %v676_v44 }
 0x2ca   :  { %v673_v5 = vmax.f32 %v2264_v25, 0.0  ;;  %v674_v11 = vmax.f32 %v2266_v26, 0.0  ;;  %v933_v21 = vrot.slane %v919_v17, %v2212_v22  ;;  %v963_v47 = vrot.slane %v955_v16, %v2212_v22 }
 0x2cb   :  { %v681_v29 = vsub.f32 0.0, %v677_v27  ;;  %v682_v30 = vsub.f32 0.0, %v678_v60  ;;  %v683_v31 = vmul.f32 1.442695, %v679_v28  ;;  %v685_v33 = vmul.f32 1.442695, %v680_v58 }
 0x2cc   :  { %v937_v44 = vrot.slane %v926_v32, %v2142_v19  ;;  %v970_v27 = vrot.slane %v956_v18, %v2212_v22 }
 0x2cd   :  { %v687_v34 = vmul.f32 1.442695, %v681_v29  ;;  %v689_v35 = vmul.f32 1.442695, %v682_v30  ;;  %1957 = vpow2.f32 %v683_v31  ;;  %v941_v29 = vrot.slane %v933_v21, %v2142_v19 }
 0x2ce   :  { %1959 = vpow2.f32 %v685_v33  ;;  %v974_v30 = vrot.slane %v963_v47, %v2142_v19 }
 0x2cf   :  { %1961 = vpow2.f32 %v687_v34 }
 0x2d0   :  { %1963 = vpow2.f32 %v689_v35 }
 0x2d7   :  { %v1958_v37 = vpop.eup %1957 }
 0x2d8   :  { %v1960_v38 = vpop.eup %1959  ;;  %v691_v39 = vadd.f32 1.0, %v1958_v37  ;;  %v978_v37 = vrot.slane %v970_v27, %v2142_v19 }
 0x2d9   :  { %v1962_v40 = vpop.eup %1961  ;;  %v692_v43 = vadd.f32 1.0, %v1960_v38 }
 0x2da   :  { %v1964_v45 = vpop.eup %1963  ;;  %v693_v46 = vadd.f32 1.0, %v1962_v40  ;;  %1965 = vlog2.f32 %v691_v39 }
 0x2db   :  { %v694_v48 = vadd.f32 1.0, %v1964_v45  ;;  %1967 = vlog2.f32 %v692_v43 }
 0x2dc   :  { %1969 = vlog2.f32 %v693_v46 }
 0x2dd   :  { %1971 = vlog2.f32 %v694_v48 }
 0x2e4   :  { %v1966_v53 = vpop.eup %1965 }
 0x2e5   :  { %v1968_v55 = vpop.eup %1967  ;;  %v696_v57 = vmul.f32 0.6931472, %v1966_v53 }
 0x2e6   :  { %v1970_v59 = vpop.eup %1969  ;;  %v698_v62 = vmul.f32 0.6931472, %v1968_v55 }
 0x2e7   :  { %v1972_v0 = vpop.eup %1971  ;;  %v700_v6 = vmul.f32 0.6931472, %v1970_v59  ;;  %v703_v9 = vadd.f32 %v696_v57, %v671_v56 }
 0x2e8   :  { %v702_v12 = vmul.f32 0.6931472, %v1972_v0  ;;  %v704_v13 = vadd.f32 %v698_v62, %v672_v61 }
 0x2e9   :  { %v705_v14 = vadd.f32 %v700_v6, %v673_v5  ;;  %1973 = vtanh.f32 %v703_v9 }
 0x2ea   :  { %v706_v15 = vadd.f32 %v702_v12, %v674_v11  ;;  %1975 = vtanh.f32 %v704_v13 }
 0x2eb   :  { %1977 = vtanh.f32 %v705_v14 }
 0x2ec   :  { %1979 = vtanh.f32 %v706_v15 }
 0x2f3   :  { %v1974_v60 = vpop.eup %1973 }
 0x2f4   :  { %v1976_v28 = vpop.eup %1975  ;;  %v711_v58 = vmul.f32 %v1974_v60, %v2260_v23 }
 0x2f5   :  { %v1978_v31 = vpop.eup %1977  ;;  %v712_v33 = vmul.f32 %v1976_v28, %v2262_v24 }
 0x2f6   :  { %v1980_v34 = vpop.eup %1979  ;;  %v944_v35 = vmul.f32 %v937_v44, %v711_v58  ;;  %v713_v38 = vmul.f32 %v1978_v31, %v2264_v25 }
 0x2f7   :  { %v945_v39 = vmul.f32 %v937_v44, %v712_v33  ;;  %v714_v40 = vmul.f32 %v1980_v34, %v2266_v26 }
 0x2f8   :  { %v981_v43 = vadd.f32 %v974_v30, %v944_v35  ;;  %v946_v45 = vmul.f32 %v941_v29, %v713_v38 }
 0x2f9   :  { %v982_v46 = vadd.f32 %v974_v30, %v945_v39  ;;  %v947_v23 = vmul.f32 %v941_v29, %v714_v40 }
 0x2fa   :  { %1891 = vmatprep.mubr.msk.f32.mxu0 %vm376_vm5, %v981_v43  ;;  %1899 = vmatprep.mubr.msk.f32.mxu1 %vm376_vm5, %v981_v43  ;;  %v983_v48 = vadd.f32 %v978_v37, %v946_v45 }
 0x2fb   :  { %1892 = vmatmul.mubr.msk.f32.vlgmr.msra.gmra.mrb[8].mxu0 %vm376_vm5, %v982_v46  ;;  %1900 = vmatmul.mubr.msk.f32.vlgmr.msra.gmra.mrb[12].mxu1 %vm376_vm5, %v982_v46  ;;  %v984_v24 = vadd.f32 %v978_v37, %v947_v23 }
 0x2fc   :  { %1894 = vmatprep.mubr.msk.f32.mxu0 %vm376_vm5, %v983_v48  ;;  %1902 = vmatprep.mubr.msk.f32.mxu1 %vm376_vm5, %v983_v48 }
 0x2fd   :  { %1906 = vmatpush3.msra.mxu0 %v2236_v36  ;;  %1914 = vmatpush3.msra.mxu1 %v2131_v8 }
 0x2fe   :  { %1918 = vmatprep.subr.mxu1 %v2007_v7 }
 0x2ff   :  { %1895 = vmatmul.mubr.msk.f32.gmra.mrb[10].mxu0 %vm376_vm5, %v984_v24  ;;  %1903 = vmatmul.mubr.msk.f32.gmra.mrb[14].mxu1 %vm376_vm5, %v984_v24 }
 0x300   :  { %1907 = vmatprep.mubr.msk.f32.mxu0 %vm376_vm5, %v981_v43  ;;  %1915 = vmatprep.mubr.msk.f32.mxu1 %vm2008_vm2, %v2007_v7 }
 0x303   :  { %1908 = vmatmul.mubr.msk.f32.vlgmr.msra.gmra.mrb[12].mxu0 %vm376_vm5, %v982_v46 }
 0x304   :  { %1910 = vmatprep.mubr.msk.f32.mxu0 %vm376_vm5, %v983_v48 }
 0x307   :  { %1911 = vmatmul.mubr.msk.f32.gmra.mrb[14].mxu0 %vm376_vm5, %v984_v24 }
 0x308   :  { %1925 = vmatprep.mubr.msk.f32.mxu0 %vm44_vm1, %v2072_v1  ;;  %v1299_v1 = vsub.s32 3, %v2139_v10 }
 0x30a   :  { %v1300_v13 = vrot.slane %v2147_v20, %v1299_v1 }
 0x3ce   :  { %v1893_v8 = vpop.f32.mrb[8].mxu0  ;;  %v1901_v36 = vpop.f32.mrb[12].mxu1 }
 0x3cf   :  { %v1088_v25 = vrot.slane %v1893_v8, 7  ;;  %v1064_v26 = vpop.f32.mrb[9].mxu0  ;;  %v1167_v49 = vpop.f32.mrb[13].mxu1 }
 0x3d0   :  { %v1087_v50 = vrot.slane %v1064_v26, 7 }
 0x3d2   :  { %v1089_v51 = vsel %vm150_vm3, %v1087_v50, %v1088_v25  ;;  %v1097_v52 = vsel %vm150_vm3, 0.0, %v1087_v50  ;;  %v1896_v53 = vpop.f32.mrb[10].mxu0  ;;  %v1904_v54 = vpop.f32.mrb[14].mxu1 }
 0x3d3   :  { %v1186_v55 = vadd.f32 %v1167_v49, %v1097_v52  ;;  %v1091_v56 = vrot.slane %v1896_v53, 7  ;;  %v1074_v57 = vpop.f32.mrb[11].mxu0  ;;  %v1177_v59 = vpop.f32.mrb[15].mxu1  ;;  %v1187_v61 = vadd.f32 %v1901_v36, %v1089_v51 }
 0x3d4   :  { %v1090_v62 = vrot.slane %v1074_v57, 7 }
 0x3d6   :  { %v1092_v63 = vsel %vm150_vm3, %v1090_v62, %v1091_v56  ;;  %v1098_v0 = vsel %vm150_vm3, 0.0, %v1090_v62  ;;  %v1909_v5 = vpop.f32.mrb[12].mxu0 }
 0x3d7   :  { %v1188_v6 = vadd.f32 %v1177_v59, %v1098_v0  ;;  %v1282_v9 = vrot.slane %v1909_v5, 1  ;;  %v1258_v11 = vpop.f32.mrb[13].mxu0  ;;  %v1189_v12 = vadd.f32 %v1904_v54, %v1092_v63 }
 0x3d8   :  { %v1281_v42 = vrot.slane %v1258_v11, 1 }
 0x3d9   :  { %v1291_v14 = vsel %vm351_vm4, %v1282_v9, 0.0 }
 0x3da   :  { %v1294_v15 = vadd.f32 %v1291_v14, %v1187_v61  ;;  %v1283_v16 = vsel %vm351_vm4, %v1281_v42, %v1282_v9  ;;  %v1912_v17 = vpop.f32.mrb[14].mxu0 }
 0x3db   :  { %v1293_v32 = vadd.f32 %v1283_v16, %v1186_v55  ;;  %v1285_v18 = vrot.slane %v1912_v17, 1  ;;  %v1268_v21 = vpop.f32.mrb[15].mxu0 }
 0x3dc   :  { %v2323_v47 = vadd.f32 %v1300_v13, %v1294_v15  ;;  %v1284_v44 = vrot.slane %v1268_v21, 1 }
 0x3dd   :  { %v2325_v27 = vadd.f32 %v1300_v13, %v1293_v32  ;;  %v1292_v60 = vsel %vm351_vm4, %v1285_v18, 0.0  ;;  %v1640_v32 = vld [vmem:[%s2435_s6] sm:$0xf] }
 0x3de   :  { %v1306_v28 = vsel %vm376_vm5, %v2323_v47, 0.0  ;;  %v1324_v58 = vmul.f32 %v2323_v47, %v2323_v47  ;;  %v1296_v29 = vadd.f32 %v1292_v60, %v1189_v12  ;;  %v1286_v30 = vsel %vm351_vm4, %v1284_v44, %v1285_v18  ;;  %1923 = vmatprep.subr.msk.mxu0 %vm57_vm0, %v1640_v32 }
 0x3df   :  { %v1305_v31 = vsel %vm376_vm5, %v2325_v27, 0.0  ;;  %v1323_v33 = vmul.f32 %v2325_v27, %v2325_v27  ;;  %v1295_v34 = vadd.f32 %v1286_v30, %v1188_v6  ;;  %1924 = vmatpush3.msk.msra.mxu0 %vm57_vm0, %v1640_v32 }
 0x3e0   :  { %v1328_v35 = vsel %vm376_vm5, %v1324_v58, 0.0  ;;  %v1307_v37 = vadd.f32 %v1306_v28, %v1305_v31  ;;  %v2338_v38 = vadd.f32 %v1300_v13, %v1296_v29  ;;  %1926 = vmatmul.mubr.msk.f32.vlgmr.msra.gmra.mrb[16].mxu0 %vm44_vm1, %v2084_v3 }
 0x3e1   :  { %v1327_v39 = vsel %vm376_vm5, %v1323_v33, 0.0  ;;  %v2341_v40 = vadd.f32 %v1300_v13, %v1295_v34  ;;  %1928 = vmatprep.mubr.msk.f32.mxu0 %vm44_vm1, %v2077_v2  ;;  %v1518_v33 = vsub.s32 5, %v2139_v10 }
 0x3e2   :  { %v1308_v43 = vrot.slane %v1307_v37, 4  ;;  %v1329_v45 = vadd.f32 %v1328_v35, %v1327_v39  ;;  %v1315_v46 = vsel %vm376_vm5, %v2338_v38, 0.0  ;;  %v1326_v23 = vmul.f32 %v2338_v38, %v2338_v38 }
 0x3e3   :  { %v1314_v48 = vsel %vm376_vm5, %v2341_v40, 0.0  ;;  %v1325_v24 = vmul.f32 %v2341_v40, %v2341_v40  ;;  %v1519_v39 = vrot.slane %v2147_v20, %v1518_v33 }
 0x3e4   :  { %v1309_v8 = vadd.f32 %v1308_v43, %v1307_v37  ;;  %v1330_v36 = vrot.slane %v1329_v45, 4  ;;  %v1337_v25 = vsel %vm376_vm5, %v1326_v23, 0.0  ;;  %v1316_v26 = vadd.f32 %v1315_v46, %v1314_v48  ;;  %1929 = vmatmul.mubr.msk.f32.gmra.mrb[18].mxu0 %vm44_vm1, %v2089_v4 }
 0x3e5   :  { %v1336_v49 = vsel %vm376_vm5, %v1325_v24, 0.0  ;;  %v1509_v4 = vsub.s32 4, %v2139_v10 }
 0x3e6   :  { %v1310_v50 = vrot.slane %v1309_v8, 2  ;;  %v1331_v51 = vadd.f32 %v1330_v36, %v1329_v45  ;;  %v1317_v52 = vrot.slane %v1316_v26, 4  ;;  %v1338_v53 = vadd.f32 %v1337_v25, %v1336_v49 }
 0x3e7   :  { %v1510_v31 = vrot.slane %v2147_v20, %v1509_v4 }
 0x3e8   :  { %v1318_v54 = vadd.f32 %v1317_v52, %v1316_v26  ;;  %v1339_v55 = vrot.slane %v1338_v53, 4  ;;  %v1332_v56 = vrot.slane %v1331_v51, 2  ;;  %v1311_v61 = vadd.f32 %v1310_v50, %v1309_v8 }
 0x3ea   :  { %v1319_v57 = vrot.slane %v1318_v54, 2  ;;  %v1340_v59 = vadd.f32 %v1339_v55, %v1338_v53  ;;  %v1333_v62 = vadd.f32 %v1332_v56, %v1331_v51  ;;  %v1312_v0 = vrot.slane %v1311_v61, 1 }
 0x3ec   :  { %v1320_v1 = vadd.f32 %v1319_v57, %v1318_v54  ;;  %v1341_v63 = vrot.slane %v1340_v59, 2  ;;  %v1334_v6 = vrot.slane %v1333_v62, 1  ;;  %v1313_v13 = vadd.f32 %v1312_v0, %v1311_v61 }
 0x3ee   :  { %v1321_v5 = vrot.slane %v1320_v1, 1  ;;  %v1342_v9 = vadd.f32 %v1341_v63, %v1340_v59  ;;  %v1335_v42 = vadd.f32 %v1334_v6, %v1333_v62 }
 0x3f0   :  { %v1322_v11 = vadd.f32 %v1321_v5, %v1320_v1  ;;  %v1343_v12 = vrot.slane %v1342_v9, 1 }
 0x3f2   :  { %v1344_v14 = vadd.f32 %v1343_v12, %v1342_v9  ;;  %v1347_v15 = vsel %vm419_vm6, %v1322_v11, %v1313_v13 }
 0x3f4   :  { %v1351_v16 = vsel %vm424_vm7, %v1344_v14, %v1335_v42 }
 0x3f5   :  { %v1353_v17 = vsel %vm427_vm8, %v1347_v15, %v1351_v16 }
 0x3f6   :  { %1916 = vmatmul.mubr.msk.f32.vlgmr.msra.gmra.mrb[16].mxu1 %vm376_vm5, %v1353_v17 }
 0x3f7   :  { %1919 = vmatpush3.msra.mxu1 %v2192_v41  ;;  %1920 = vmatprep.mubr.msk.f32.mxu1 %vm2008_vm2, %v2007_v7 }
 0x4b3   :  { %v2372_v7 = vpop.f32.mrb[16].mxu0 }
 0x4b4   :  { %v2374_v21 = vpop.f32.mrb[17].mxu0 }
 0x4b7   :  { %v2376_v44 = vpop.f32.mrb[18].mxu0 }
 0x4b8   :  { %v2378_v60 = vpop.f32.mrb[19].mxu0 }
 0x4c9   :  { %v1423_v41 = vpop.f32.mrb[16].mxu1 }
 0x4ca   :  { %v1917_v18 = vpop.f32.mrb[17].mxu1  ;;  %1921 = vmatmul.mubr.msk.f32.vlgmr.msra.gmra.mrb[18].mxu1 %vm376_vm5, %v1423_v41 }
 0x59d   :  { %v1496_v28 = vpop.f32.mrb[18].mxu1 }
 0x59e   :  { %v1500_v3 = vmul.f32 %v1496_v28, %v1496_v28  ;;  %v1922_v58 = vpop.f32.mrb[19].mxu1 }
 0x5a0   :  { %v1502_v29 = vrot.slane %v1500_v3, 6 }
 0x5a2   :  { %v1504_v2 = vsub.f32 %v1496_v28, %v1502_v29 }
 0x5a4   :  { %v1505_v30 = vadd.f32 1e-05, %v1504_v2 }
 0x5a6   :  { %1981 = vrsqrt.f32 %v1505_v30 }
 0x5b0   :  { %v1982_v34 = vpop.eup %1981 }
 0x5b1   :  { %v1511_v35 = vmul.f32 %v1982_v34, %v1510_v31 }
 0x5b3   :  { %v1513_v37 = vrot.slane %v1511_v35, 2  ;;  %v1527_v43 = vrot.slane %v1511_v35, %v2212_v22 }
 0x5b5   :  { %v1515_v45 = vmul.f32 %v1513_v37, %v1496_v28  ;;  %v1528_v46 = vcombine.high %v1527_v43, %v1527_v43  ;;  %v1535_v23 = vrot.slane %v1527_v43, %v2212_v22  ;;  %v1791_v43 = vld [vmem:[%s2429_s7 + $0x8] ss:$0 sm:$0xff] }
 0x5b7   :  { %v1520_v48 = vsub.f32 %v1519_v39, %v1515_v45  ;;  %v1542_v24 = vrot.slane %v1528_v46, %v2212_v22  ;;  %v1543_v8 = vcombine.high %v1535_v23, %v1535_v23 }
 0x5b9   :  { %v1544_v36 = vcombine.high %v1542_v24, %v1542_v24  ;;  %v1566_v25 = vrot.slane %v1520_v48, %v2212_v22  ;;  %v1548_v10 = vrot.slane %v1543_v8, %v2142_v19  ;;  %v1734_v48 = vadd.f32 %v2372_v7, %v1791_v43 }
 0x5ba   :  { %v1733_v8 = vadd.f32 %v1791_v43, %v2374_v21 }
 0x5bb   :  { %v1567_v26 = vcombine.high %v1566_v25, %v1566_v25  ;;  %v1574_v49 = vrot.slane %v1566_v25, %v2212_v22  ;;  %v1552_v20 = vrot.slane %v1544_v36, %v2142_v19  ;;  %v1556_v51 = vmul.f32 %v1548_v10, %v2323_v47 }
 0x5bc   :  { %v1555_v53 = vmul.f32 %v1548_v10, %v2325_v27  ;;  %v1736_v36 = vadd.f32 %v2376_v44, %v1791_v43 }
 0x5bd   :  { %v1581_v50 = vrot.slane %v1567_v26, %v2212_v22  ;;  %v1585_v52 = vrot.slane %v1574_v49, %v2142_v19  ;;  %v1558_v57 = vmul.f32 %v1552_v20, %v2338_v38  ;;  %v1557_v59 = vmul.f32 %v1552_v20, %v2341_v40 }
 0x5be   :  { %v1735_v26 = vadd.f32 %v1791_v43, %v2378_v60 }
 0x5bf   :  { %v1593_v54 = vadd.f32 %v1585_v52, %v1556_v51  ;;  %v1592_v55 = vadd.f32 %v1585_v52, %v1555_v53  ;;  %v1589_v56 = vrot.slane %v1581_v50, %v2142_v19 }
 0x5c1   :  { %v1601_v61 = vand.u32 2147483647, %v1593_v54  ;;  %v1600_v62 = vand.u32 2147483647, %v1592_v55  ;;  %v1595_v1 = vadd.f32 %v1589_v56, %v1558_v57  ;;  %v2398_v63 = vadd.f32 %v1589_v56, %v1557_v59 }
 0x5c2   :  { %v1597_v18 = vmax.f32 %v1593_v54, 0.0  ;;  %v1596_v3 = vmax.f32 %v1592_v55, 0.0 }
 0x5c3   :  { %v1605_v22 = vsub.f32 0.0, %v1601_v61  ;;  %v1604_v0 = vsub.f32 0.0, %v1600_v62  ;;  %v1603_v47 = vand.u32 2147483647, %v1595_v1  ;;  %v1602_v5 = vand.u32 2147483647, %v2398_v63 }
 0x5c4   :  { %v1599_v31 = vmax.f32 %v1595_v1, 0.0  ;;  %v1598_v34 = vmax.f32 %v2398_v63, 0.0 }
 0x5c5   :  { %v1610_v6 = vmul.f32 1.442695, %v1605_v22  ;;  %v1608_v27 = vmul.f32 1.442695, %v1604_v0  ;;  %v1607_v9 = vsub.f32 0.0, %v1603_v47  ;;  %v1606_v11 = vsub.f32 0.0, %v1602_v5 }
 0x5c7   :  { %1983 = vpow2.f32 %v1610_v6  ;;  %v1614_v19 = vmul.f32 1.442695, %v1607_v9  ;;  %v1612_v38 = vmul.f32 1.442695, %v1606_v11 }
 0x5c8   :  { %1985 = vpow2.f32 %v1608_v27 }
 0x5c9   :  { %1987 = vpow2.f32 %v1614_v19 }
 0x5ca   :  { %1989 = vpow2.f32 %v1612_v38 }
 0x5d1   :  { %v1984_v40 = vpop.eup %1983 }
 0x5d2   :  { %v1986_v12 = vpop.eup %1985  ;;  %v1617_v13 = vadd.f32 1.0, %v1984_v40 }
 0x5d3   :  { %v1616_v42 = vadd.f32 1.0, %v1986_v12  ;;  %v1988_v14 = vpop.eup %1987 }
 0x5d4   :  { %1991 = vlog2.f32 %v1617_v13  ;;  %v1990_v15 = vpop.eup %1989  ;;  %v1619_v16 = vadd.f32 1.0, %v1988_v14 }
 0x5d5   :  { %1993 = vlog2.f32 %v1616_v42  ;;  %v1618_v17 = vadd.f32 1.0, %v1990_v15 }
 0x5d6   :  { %1995 = vlog2.f32 %v1619_v16 }
 0x5d7   :  { %1997 = vlog2.f32 %v1618_v17 }
 0x5de   :  { %v1992_v32 = vpop.eup %1991 }
 0x5df   :  { %v1994_v41 = vpop.eup %1993  ;;  %v1623_v28 = vmul.f32 0.6931472, %v1992_v32 }
 0x5e0   :  { %v1621_v58 = vmul.f32 0.6931472, %v1994_v41  ;;  %v1996_v29 = vpop.eup %1995 }
 0x5e1   :  { %v1629_v2 = vadd.f32 %v1623_v28, %v1597_v18  ;;  %v1998_v30 = vpop.eup %1997  ;;  %v1627_v33 = vmul.f32 0.6931472, %v1996_v29 }
 0x5e2   :  { %v1628_v4 = vadd.f32 %v1621_v58, %v1596_v3  ;;  %v1625_v35 = vmul.f32 0.6931472, %v1998_v30 }
 0x5e3   :  { %1999 = vtanh.f32 %v1629_v2  ;;  %v1631_v37 = vadd.f32 %v1627_v33, %v1599_v31 }
 0x5e4   :  { %2001 = vtanh.f32 %v1628_v4  ;;  %v1630_v39 = vadd.f32 %v1625_v35, %v1598_v34 }
 0x5e5   :  { %2003 = vtanh.f32 %v1631_v37 }
 0x5e6   :  { %2005 = vtanh.f32 %v1630_v39 }
 0x5ed   :  { %v2000_v45 = vpop.eup %1999 }
 0x5ee   :  { %v2002_v46 = vpop.eup %2001  ;;  %v1637_v23 = vmul.f32 %v2000_v45, %v1593_v54 }
 0x5ef   :  { %v1636_v24 = vmul.f32 %v2002_v46, %v1592_v55  ;;  %v2004_v25 = vpop.eup %2003 }
 0x5f0   :  { %v1738_v10 = vadd.f32 %v1734_v48, %v1637_v23  ;;  %v2006_v49 = vpop.eup %2005  ;;  %v1639_v50 = vmul.f32 %v2004_v25, %v1595_v1 }
 0x5f1   :  { %v1737_v20 = vadd.f32 %v1733_v8, %v1636_v24  ;;  %v1638_v51 = vmul.f32 %v2006_v49, %v2398_v63 }
 0x5f2   :  { %1742 = vst.msk [vmem:[%s2436_s10 + $0x8] sm:$0xff] %vm376_vm5, %v1738_v10  ;;  %v1740_v7 = vadd.f32 %v1736_v36, %v1639_v50 }
 0x5f3   :  { %1741 = vst.msk [vmem:[%s2436_s10] sm:$0xff] %vm376_vm5, %v1737_v20  ;;  %v1739_v21 = vadd.f32 %v1735_v26, %v1638_v51 }
 0x5f4   :  { %1744 = vst.msk [vmem:[%s2436_s10 + $0x18] sm:$0xff] %vm376_vm5, %v1740_v7 }
 0x5f5   :  { %1743 = vst.msk [vmem:[%s2436_s10 + $0x10] sm:$0xff] %vm376_vm5, %v1739_v21 }

// kernel: tpu_custom_call.1
= control target key start
LH: loop header
LB: loop body
LE: loop exit
PB: predicated region body
PF: predicated region fallthrough
CT: control target
= control target key end

     0   :  { %vm57_vm0 = vcmask 1043456   ;;  %vm44_vm1 = vcmask 31744   ;;  %v2007_v7 = vmov 0.0   ;;  %vm2008_vm2 = vmmov 0   ;;  %s2426_s2 = inlined_call_operand.vmem [shape: f32[3,4,8], index: 2, kind: input, shape index: {}]   ;;  %s2427_s0 = inlined_call_operand.vmem [shape: f32[2,16,4], index: 0, kind: input, shape index: {}]   ;;  %s2428_s8 = inlined_call_operand.vmem [shape: f32[8,8], index: 8, kind: input, shape index: {}]   ;;  %s2429_s7 = inlined_call_operand.vmem [shape: f32[9,8], index: 7, kind: input, shape index: {}]   ;;  %s2430_s9 = inlined_call_operand.vmem [shape: f32[8,8], index: 9, kind: input, shape index: {}]   ;;  %s2431_s5 = inlined_call_operand.vmem [shape: f32[16,8], index: 5, kind: input, shape index: {}]   ;;  %s2432_s1 = inlined_call_operand.vmem [shape: f32[2,1,16], index: 1, kind: input, shape index: {}]   ;;  %s2433_s4 = inlined_call_operand.vmem [shape: f32[16,8], index: 4, kind: input, shape index: {}]   ;;  %s2434_s3 = inlined_call_operand.vmem [shape: f32[3,8,8], index: 3, kind: input, shape index: {}]   ;;  %s2435_s6 = inlined_call_operand.vmem [shape: f32[4,8], index: 6, kind: input, shape index: {}]   ;;  %s2436_s10 = inlined_call_operand.vmem [shape: f32[2,16,8], index: 10, kind: output, shape index: {}]  }
   0x1   :  { %v43_v0 = vld [vmem:[%s2426_s2] sm:$0xf]  ;;  %v2077_v2 = vld [vmem:[%s2427_s0 + $0x10] sm:$0xff]  ;;  %v2084_v3 = vld [vmem:[%s2427_s0 + $0x8] sm:$0xff]  ;;  %v368_v9 = vlaneseq  ;;  %vm150_vm3 = vcmask 1040384   ;;  %vm351_vm4 = vcmask 1046528  }
   0x2   :  { %v2072_v1 = vld [vmem:[%s2427_s0] sm:$0xff]  ;;  %1841 = vmatprep.subr.msk.mxu0 %vm57_vm0, %v43_v0  ;;  %1937 = vmatprep.subr.msk.mxu1 %vm57_vm0, %v43_v0  ;;  %v2089_v4 = vld [vmem:[%s2427_s0 + $0x18] sm:$0xff]  ;;  %v1760_v5 = vld [vmem:[%s2426_s2 + $0x8] sm:$0xf]  ;;  %vm376_vm5 = vcmask 64512   ;;  %vm419_vm6 = vcmask 1041409  }
   0x3   :  { %1842 = vmatpush3.msk.msra.mxu0 %vm57_vm0, %v43_v0  ;;  %1938 = vmatpush3.msk.msra.mxu1 %vm57_vm0, %v43_v0  ;;  %v1754_v6 = vld [vmem:[%s2426_s2 + $0x4] sm:$0xf]  ;;  %v2139_v10 = vshrl.u32 %v368_v9, 7  ;;  %vm424_vm7 = vcmask 1043459   ;;  %vm427_vm8 = vcmask 1041408   ;;  %vm762_vm9 = vcmask 130048  }
   0x4   :  { %1843 = vmatprep.mubr.msk.f32.mxu0 %vm44_vm1, %v2072_v1  ;;  %1846 = vmatprep.mubr.msk.f32.mxu1 %vm44_vm1, %v2077_v2  ;;  %v2131_v8 = vld [vmem:[%s2428_s8] sm:$0xff] }
   0x5   :  { %1844 = vmatmul.mubr.msk.f32.vlgmr.msra.gmra.mrb[0].mxu0 %vm44_vm1, %v2084_v3  ;;  %1847 = vmatmul.mubr.msk.f32.vlgmr.msra.gmra.mrb[0].mxu1 %vm44_vm1, %v2089_v4  ;;  %v2142_v19 = vsub.s32 0, %v2139_v10  ;;  %v2147_v20 = vld [vmem:[%s2429_s7] sm:$0xff] }
   0x6   :  { %1857 = vmatprep.subr.msk.mxu0 %vm57_vm0, %v1760_v5  ;;  %1849 = vmatprep.subr.msk.mxu1 %vm57_vm0, %v1754_v6 }
   0x7   :  { %1858 = vmatpush3.msk.msra.mxu0 %vm57_vm0, %v1760_v5  ;;  %1850 = vmatpush3.msk.msra.mxu1 %vm57_vm0, %v1754_v6  ;;  %v371_v30 = vrot.slane %v2147_v20, %v2142_v19 }
   0x8   :  { %1851 = vmatprep.mubr.msk.f32.mxu1 %vm44_vm1, %v2072_v1  ;;  %1859 = vmatprep.mubr.msk.f32.mxu0 %vm44_vm1, %v2072_v1 }
   0x9   :  { %1852 = vmatmul.mubr.msk.f32.vlgmr.msra.gmra.mrb[2].mxu1 %vm44_vm1, %v2084_v3  ;;  %1860 = vmatmul.mubr.msk.f32.vlgmr.msra.gmra.mrb[2].mxu0 %vm44_vm1, %v2084_v3 }
   0xa   :  { %1854 = vmatprep.mubr.msk.f32.mxu1 %vm44_vm1, %v2077_v2  ;;  %1862 = vmatprep.mubr.msk.f32.mxu0 %vm44_vm1, %v2077_v2 }
   0xb   :  { %1865 = vmatprep.subr.mxu1 %v2007_v7 }
   0xc   :  { %1866 = vmatpush3.msra.mxu1 %v2131_v8 }
   0xd   :  { %1855 = vmatmul.mubr.msk.f32.gmra.mrb[4].mxu1 %vm44_vm1, %v2089_v4  ;;  %1863 = vmatmul.mubr.msk.f32.gmra.mrb[4].mxu0 %vm44_vm1, %v2089_v4 }
   0xe   :  { %1867 = vmatprep.mubr.msk.f32.mxu1 %vm2008_vm2, %v2007_v7  ;;  %1879 = vmatprep.mubr.msk.f32.mxu0 %vm2008_vm2, %v2007_v7 }
   0xf   :  { %1870 = vmatprep.subr.mxu1 %v2007_v7 }
  0xd8   :  { %v1845_v11 = vpop.f32.mrb[0].mxu0  ;;  %v1848_v12 = vpop.f32.mrb[0].mxu1 }
  0xd9   :  { %v152_v13 = vrot.slane %v1845_v11, 7  ;;  %v127_v14 = vpop.f32.mrb[1].mxu0  ;;  %v155_v15 = vrot.slane %v1848_v12, 7  ;;  %v137_v16 = vpop.f32.mrb[1].mxu1 }
  0xda   :  { %v151_v17 = vrot.slane %v127_v14, 7  ;;  %v154_v18 = vrot.slane %v137_v16, 7 }
  0xdc   :  { %v153_v21 = vsel %vm150_vm3, %v151_v17, %v152_v13  ;;  %v1853_v22 = vpop.f32.mrb[2].mxu1  ;;  %v1861_v23 = vpop.f32.mrb[2].mxu0  ;;  %v161_v24 = vsel %vm150_vm3, 0.0, %v151_v17  ;;  %v156_v25 = vsel %vm150_vm3, %v154_v18, %v155_v15  ;;  %v162_v41 = vsel %vm150_vm3, 0.0, %v154_v18 }
  0xdd   :  { %v254_v26 = vadd.f32 %v1853_v22, %v153_v21  ;;  %v353_v27 = vrot.slane %v1861_v23, 1  ;;  %v234_v28 = vpop.f32.mrb[3].mxu1  ;;  %v328_v29 = vpop.f32.mrb[3].mxu0 }
  0xde   :  { %v253_v31 = vadd.f32 %v234_v28, %v161_v24  ;;  %v352_v32 = vrot.slane %v328_v29, 1 }
  0xdf   :  { %v362_v33 = vsel %vm351_vm4, %v353_v27, 0.0 }
  0xe0   :  { %v365_v34 = vadd.f32 %v362_v33, %v254_v26  ;;  %v354_v35 = vsel %vm351_vm4, %v352_v32, %v353_v27  ;;  %v1856_v36 = vpop.f32.mrb[4].mxu1  ;;  %v1864_v37 = vpop.f32.mrb[4].mxu0 }
  0xe1   :  { %v364_v38 = vadd.f32 %v354_v35, %v253_v31  ;;  %v256_v39 = vadd.f32 %v1856_v36, %v156_v25  ;;  %v356_v40 = vrot.slane %v1864_v37, 1  ;;  %v244_v42 = vpop.f32.mrb[5].mxu1  ;;  %v338_v43 = vpop.f32.mrb[5].mxu0 }
  0xe2   :  { %v2157_v44 = vadd.f32 %v371_v30, %v365_v34  ;;  %v255_v45 = vadd.f32 %v244_v42, %v162_v41  ;;  %v355_v46 = vrot.slane %v338_v43, 1  ;;  %v2192_v41 = vld [vmem:[%s2430_s9] sm:$0xff]  ;;  %v2009_v43 = vmov 0.0|0.0  }
  0xe3   :  { %v2159_v47 = vadd.f32 %v371_v30, %v364_v38  ;;  %v363_v48 = vsel %vm351_vm4, %v356_v40, 0.0  ;;  %1931 = vmatprep.subr.bf16.mxu0 %v2009_v43 }
  0xe4   :  { %v378_v49 = vsel %vm376_vm5, %v2157_v44, 0.0  ;;  %v396_v50 = vmul.f32 %v2157_v44, %v2157_v44  ;;  %v367_v51 = vadd.f32 %v363_v48, %v256_v39  ;;  %v357_v52 = vsel %vm351_vm4, %v355_v46, %v356_v40  ;;  %v740_v46 = vld [vmem:[%s2431_s5 + $0x8] sm:$0xff] }
  0xe5   :  { %v377_v53 = vsel %vm376_vm5, %v2159_v47, 0.0  ;;  %v395_v54 = vmul.f32 %v2159_v47, %v2159_v47  ;;  %v366_v55 = vadd.f32 %v357_v52, %v255_v45  ;;  %v739_v45 = vld [vmem:[%s2431_s5] sm:$0xff] }
  0xe6   :  { %v400_v56 = vsel %vm376_vm5, %v396_v50, 0.0  ;;  %v379_v57 = vadd.f32 %v378_v49, %v377_v53  ;;  %v2172_v58 = vadd.f32 %v371_v30, %v367_v51  ;;  %v1932_v48 = vpack.c.bf16 %v740_v46, %v739_v45  ;;  %v715_v49 = vld [vmem:[%s2432_s1] sm:$0x1]  ;;  %v716_v50 = vld [vmem:[%s2432_s1 + $0x1] sm:$0x1] }
  0xe7   :  { %v399_v59 = vsel %vm376_vm5, %v395_v54, 0.0  ;;  %v2175_v60 = vadd.f32 %v371_v30, %v366_v55  ;;  %v719_v51 = vand.u32 2147483647, %v715_v49  ;;  %v720_v52 = vand.u32 2147483647, %v716_v50 }
  0xe8   :  { %v380_v61 = vrot.slane %v379_v57, 4  ;;  %v401_v62 = vadd.f32 %v400_v56, %v399_v59  ;;  %v387_v63 = vsel %vm376_vm5, %v2172_v58, 0.0  ;;  %v398_v0 = vmul.f32 %v2172_v58, %v2172_v58  ;;  %1933 = vmatpush3.bf16.msra.mxu0 %v1932_v48 }
  0xe9   :  { %v386_v5 = vsel %vm376_vm5, %v2175_v60, 0.0  ;;  %v397_v6 = vmul.f32 %v2175_v60, %v2175_v60  ;;  %v721_v53 = vsub.f32 0.0, %v719_v51  ;;  %v722_v54 = vsub.f32 0.0, %v720_v52 }
  0xea   :  { %v381_v9 = vadd.f32 %v380_v61, %v379_v57  ;;  %v402_v11 = vrot.slane %v401_v62, 4  ;;  %v409_v12 = vsel %vm376_vm5, %v398_v0, 0.0  ;;  %v388_v13 = vadd.f32 %v387_v63, %v386_v5 }
  0xeb   :  { %v408_v14 = vsel %vm376_vm5, %v397_v6, 0.0  ;;  %v723_v55 = vmul.f32 1.442695, %v721_v53  ;;  %v725_v56 = vmul.f32 1.442695, %v722_v54  ;;  %v717_v63 = vmax.f32 %v715_v49, 0.0 }
  0xec   :  { %v382_v15 = vrot.slane %v381_v9, 2  ;;  %v403_v16 = vadd.f32 %v402_v11, %v401_v62  ;;  %v389_v17 = vrot.slane %v388_v13, 4  ;;  %v410_v18 = vadd.f32 %v409_v12, %v408_v14 }
  0xed   :  { %1943 = vpow2.f32 %v723_v55  ;;  %v718_v5 = vmax.f32 %v716_v50, 0.0  ;;  %v2010_v14 = vmov 1966171168   ;;  %v584_v48 = vsub.s32 1, %v2139_v10 }
  0xee   :  { %v390_v21 = vadd.f32 %v389_v17, %v388_v13  ;;  %v411_v22 = vrot.slane %v410_v18, 4  ;;  %v404_v23 = vrot.slane %v403_v16, 2  ;;  %v383_v26 = vadd.f32 %v382_v15, %v381_v9 }
  0xef   :  { %1945 = vpow2.f32 %v725_v56  ;;  %v597_v15 = vunpack.c.l.s4 %v2010_v14 }
  0xf0   :  { %v391_v24 = vrot.slane %v390_v21, 2  ;;  %v412_v25 = vadd.f32 %v411_v22, %v410_v18  ;;  %v405_v27 = vadd.f32 %v404_v23, %v403_v16  ;;  %v384_v30 = vrot.slane %v383_v26, 1 }
  0xf1   :  { %v598_v16 = vunpack.c.0.s8 %v597_v15 }
  0xf2   :  { %v392_v28 = vadd.f32 %v391_v24, %v390_v21  ;;  %v413_v29 = vrot.slane %v412_v25, 2  ;;  %v406_v32 = vrot.slane %v405_v27, 1  ;;  %v385_v36 = vadd.f32 %v384_v30, %v383_v26 }
  0xf3   :  { %v2212_v22 = vsub.s32 %v598_v16, %v2139_v10 }
  0xf4   :  { %v393_v31 = vrot.slane %v392_v28, 1  ;;  %v414_v33 = vadd.f32 %v413_v29, %v412_v25  ;;  %v407_v37 = vadd.f32 %v406_v32, %v405_v27  ;;  %v835_v27 = vld [vmem:[%s2433_s4] sm:$0xff] }
  0xf6   :  { %v394_v34 = vadd.f32 %v393_v31, %v392_v28  ;;  %v415_v35 = vrot.slane %v414_v33, 1  ;;  %v836_v28 = vld [vmem:[%s2433_s4 + $0x8] sm:$0xff] }
  0xf7   :  { %v1944_v57 = vpop.eup %1943  ;;  %v1935_v29 = vpack.c.bf16 %v836_v28, %v835_v27 }
  0xf8   :  { %v416_v38 = vadd.f32 %v415_v35, %v414_v33  ;;  %v420_v39 = vsel %vm419_vm6, %v394_v34, %v385_v36  ;;  %v727_v61 = vadd.f32 1.0, %v1944_v57  ;;  %v985_v34 = vld [vmem:[%s2434_s3] sm:$0xff]  ;;  %v1774_v35 = vld [vmem:[%s2434_s3 + $0x8] sm:$0xff]  ;;  %v2236_v36 = vld [vmem:[%s2434_s3 + $0x10] sm:$0xff] }
  0xf9   :  { %v1946_v59 = vpop.eup %1945  ;;  %1889 = vmatprep.subr.mxu0 %v985_v34 }
  0xfa   :  { %v425_v40 = vsel %vm424_vm7, %v416_v38, %v407_v37  ;;  %v728_v62 = vadd.f32 1.0, %v1946_v59  ;;  %1947 = vlog2.f32 %v727_v61 }
  0xfb   :  { %v428_v42 = vsel %vm427_vm8, %v420_v39, %v425_v40 }
  0xfc   :  { %1868 = vmatmul.mubr.msk.f32.vlgmr.msra.gmra.mrb[6].mxu1 %vm376_vm5, %v428_v42  ;;  %1949 = vlog2.f32 %v728_v62 }
  0xfd   :  { %1871 = vmatpush3.msra.mxu1 %v2192_v41  ;;  %1872 = vmatprep.mubr.msk.f32.mxu1 %vm2008_vm2, %v2007_v7 }
  0xfe   :  { %1934 = vmatprep.subr.bf16.mxu1 %v2009_v43 }
 0x104   :  { %v1948_v0 = vpop.eup %1947 }
 0x105   :  { %v730_v9 = vmul.f32 0.6931472, %v1948_v0 }
 0x106   :  { %v1950_v6 = vpop.eup %1949 }
 0x107   :  { %v732_v11 = vmul.f32 0.6931472, %v1950_v6  ;;  %v733_v12 = vadd.f32 %v730_v9, %v717_v63 }
 0x109   :  { %v734_v13 = vadd.f32 %v732_v11, %v718_v5  ;;  %1951 = vtanh.f32 %v733_v12 }
 0x10b   :  { %1953 = vtanh.f32 %v734_v13 }
 0x113   :  { %v1952_v17 = vpop.eup %1951 }
 0x114   :  { %v737_v21 = vmul.f32 %v1952_v17, %v715_v49  ;;  %v585_v49 = vrot.slane %v2147_v20, %v584_v48 }
 0x115   :  { %v1954_v18 = vpop.eup %1953 }
 0x116   :  { %v738_v23 = vmul.f32 %v1954_v18, %v716_v50  ;;  %v593_v50 = vsub.s32 2, %v2139_v10 }
 0x118   :  { %v747_v24 = vcombine.low %v737_v21, %v738_v23  ;;  %v594_v54 = vrot.slane %v2147_v20, %v593_v50  ;;  %v743_v50 = vsub.s32 6, %v2139_v10 }
 0x11a   :  { %v754_v25 = vrot.slane %v747_v24, %v2212_v22 }
 0x11c   :  { %v761_v26 = vrot.slane %v754_v25, %v2212_v22 }
 0x11e   :  { %1880 = vmatmul.mubr.msk.f32.vlgmr.msra.gmra.mrb[6].mxu0 %vm762_vm9, %v761_v26 }
 0x11f   :  { %1890 = vmatpush3.msra.mxu0 %v985_v34 }
 0x120   :  { %1905 = vmatprep.subr.mxu0 %v2236_v36 }
 0x1cf   :  { %v498_v30 = vpop.f32.mrb[6].mxu1 }
 0x1d0   :  { %v1869_v31 = vpop.f32.mrb[7].mxu1  ;;  %1873 = vmatmul.mubr.msk.f32.vlgmr.msra.gmra.mrb[8].mxu1 %vm376_vm5, %v498_v30 }
 0x1d1   :  { %1936 = vmatpush3.bf16.msra.mxu1 %v1935_v29  ;;  %1886 = vmatprep.mubr.msk.f32.mxu1 %vm2008_vm2, %v2007_v7 }
 0x1d2   :  { %1897 = vmatprep.subr.mxu1 %v1774_v35 }
 0x1d4   :  { %1887 = vmatmul.mubr.msk.f32.vlgmr.msra.gmra.mrb[10].mxu1 %vm762_vm9, %v761_v26 }
 0x1d5   :  { %1898 = vmatpush3.msra.mxu1 %v1774_v35 }
 0x1d6   :  { %1913 = vmatprep.subr.mxu1 %v2007_v7 }
 0x1f1   :  { %v2225_v32 = vpop.f32.mrb[6].mxu0 }
 0x1f2   :  { %v1881_v33 = vpop.f32.mrb[7].mxu0 }
 0x2a3   :  { %v571_v37 = vpop.f32.mrb[8].mxu1 }
 0x2a4   :  { %v575_v38 = vmul.f32 %v571_v37, %v571_v37  ;;  %v1874_v39 = vpop.f32.mrb[9].mxu1 }
 0x2a6   :  { %v577_v40 = vrot.slane %v575_v38, 6 }
 0x2a7   :  { %v2240_v42 = vpop.f32.mrb[10].mxu1 }
 0x2a8   :  { %v579_v43 = vsub.f32 %v571_v37, %v577_v40  ;;  %v1888_v45 = vpop.f32.mrb[11].mxu1 }
 0x2aa   :  { %v580_v46 = vadd.f32 1e-05, %v579_v43 }
 0x2ac   :  { %1955 = vrsqrt.f32 %v580_v46 }
 0x2b6   :  { %v1956_v51 = vpop.eup %1955 }
 0x2b7   :  { %v586_v52 = vmul.f32 %v1956_v51, %v585_v49  ;;  %v839_v49 = vsub.s32 7, %v2139_v10 }
 0x2b9   :  { %v588_v53 = vrot.slane %v586_v52, 2  ;;  %v602_v55 = vrot.slane %v586_v52, %v2212_v22  ;;  %v840_v51 = vrot.slane %v2147_v20, %v839_v49  ;;  %v744_v52 = vrot.slane %v2147_v20, %v743_v50 }
 0x2bb   :  { %v590_v56 = vmul.f32 %v588_v53, %v571_v37  ;;  %v603_v57 = vcombine.high %v602_v55, %v602_v55  ;;  %v610_v59 = vrot.slane %v602_v55, %v2212_v22 }
 0x2bd   :  { %v595_v61 = vsub.f32 %v594_v54, %v590_v56  ;;  %v617_v62 = vrot.slane %v603_v57, %v2212_v22  ;;  %v618_v63 = vcombine.high %v610_v59, %v610_v59  ;;  %v908_v54 = vadd.f32 %v2240_v42, %v840_v51 }
 0x2bf   :  { %v619_v0 = vcombine.high %v617_v62, %v617_v62  ;;  %v641_v5 = vrot.slane %v595_v61, %v2212_v22  ;;  %v623_v6 = vrot.slane %v618_v63, %v2142_v19  ;;  %v832_v63 = vadd.f32 %v2225_v32, %v744_v52 }
 0x2c0   :  { %v918_v42 = vrot.slane %v908_v54, %v2212_v22 }
 0x2c1   :  { %v627_v9 = vrot.slane %v619_v0, %v2142_v19  ;;  %v642_v11 = vcombine.high %v641_v5, %v641_v5  ;;  %v649_v12 = vrot.slane %v641_v5, %v2212_v22  ;;  %v630_v14 = vmul.f32 %v623_v6, %v2159_v47 }
 0x2c2   :  { %v631_v15 = vmul.f32 %v623_v6, %v2157_v44  ;;  %v926_v32 = vrot.slane %v918_v42, %v2212_v22 }
 0x2c3   :  { %v656_v13 = vrot.slane %v642_v11, %v2212_v22  ;;  %v660_v16 = vrot.slane %v649_v12, %v2142_v19  ;;  %v632_v17 = vmul.f32 %v627_v9, %v2175_v60  ;;  %v633_v18 = vmul.f32 %v627_v9, %v2172_v58 }
 0x2c5   :  { %v664_v21 = vrot.slane %v656_v13, %v2142_v19  ;;  %v2260_v23 = vadd.f32 %v660_v16, %v630_v14  ;;  %v2262_v24 = vadd.f32 %v660_v16, %v631_v15  ;;  %v955_v16 = vrot.slane %v832_v63, %v2212_v22 }
 0x2c7   :  { %v2264_v25 = vadd.f32 %v664_v21, %v632_v17  ;;  %v2266_v26 = vadd.f32 %v664_v21, %v633_v18  ;;  %v675_v47 = vand.u32 2147483647, %v2260_v23  ;;  %v676_v44 = vand.u32 2147483647, %v2262_v24 }
 0x2c8   :  { %v671_v56 = vmax.f32 %v2260_v23, 0.0  ;;  %v672_v61 = vmax.f32 %v2262_v24, 0.0  ;;  %v919_v17 = vcombine.high %v918_v42, %v918_v42  ;;  %v956_v18 = vcombine.high %v955_v16, %v955_v16 }
 0x2c9   :  { %v677_v27 = vand.u32 2147483647, %v2264_v25  ;;  %v678_v60 = vand.u32 2147483647, %v2266_v26  ;;  %v679_v28 = vsub.f32 0.0, %v675_v47  ;;  %v680_v58 = vsub.f32 0.0, %v676_v44 }
 0x2ca   :  { %v673_v5 = vmax.f32 %v2264_v25, 0.0  ;;  %v674_v11 = vmax.f32 %v2266_v26, 0.0  ;;  %v933_v21 = vrot.slane %v919_v17, %v2212_v22  ;;  %v963_v47 = vrot.slane %v955_v16, %v2212_v22 }
 0x2cb   :  { %v681_v29 = vsub.f32 0.0, %v677_v27  ;;  %v682_v30 = vsub.f32 0.0, %v678_v60  ;;  %v683_v31 = vmul.f32 1.442695, %v679_v28  ;;  %v685_v33 = vmul.f32 1.442695, %v680_v58 }
 0x2cc   :  { %v937_v44 = vrot.slane %v926_v32, %v2142_v19  ;;  %v970_v27 = vrot.slane %v956_v18, %v2212_v22 }
 0x2cd   :  { %v687_v34 = vmul.f32 1.442695, %v681_v29  ;;  %v689_v35 = vmul.f32 1.442695, %v682_v30  ;;  %1957 = vpow2.f32 %v683_v31  ;;  %v941_v29 = vrot.slane %v933_v21, %v2142_v19 }
 0x2ce   :  { %1959 = vpow2.f32 %v685_v33  ;;  %v974_v30 = vrot.slane %v963_v47, %v2142_v19 }
 0x2cf   :  { %1961 = vpow2.f32 %v687_v34 }
 0x2d0   :  { %1963 = vpow2.f32 %v689_v35 }
 0x2d7   :  { %v1958_v37 = vpop.eup %1957 }
 0x2d8   :  { %v1960_v38 = vpop.eup %1959  ;;  %v691_v39 = vadd.f32 1.0, %v1958_v37  ;;  %v978_v37 = vrot.slane %v970_v27, %v2142_v19 }
 0x2d9   :  { %v1962_v40 = vpop.eup %1961  ;;  %v692_v43 = vadd.f32 1.0, %v1960_v38 }
 0x2da   :  { %v1964_v45 = vpop.eup %1963  ;;  %v693_v46 = vadd.f32 1.0, %v1962_v40  ;;  %1965 = vlog2.f32 %v691_v39 }
 0x2db   :  { %v694_v48 = vadd.f32 1.0, %v1964_v45  ;;  %1967 = vlog2.f32 %v692_v43 }
 0x2dc   :  { %1969 = vlog2.f32 %v693_v46 }
 0x2dd   :  { %1971 = vlog2.f32 %v694_v48 }
 0x2e4   :  { %v1966_v53 = vpop.eup %1965 }
 0x2e5   :  { %v1968_v55 = vpop.eup %1967  ;;  %v696_v57 = vmul.f32 0.6931472, %v1966_v53 }
 0x2e6   :  { %v1970_v59 = vpop.eup %1969  ;;  %v698_v62 = vmul.f32 0.6931472, %v1968_v55 }
 0x2e7   :  { %v1972_v0 = vpop.eup %1971  ;;  %v700_v6 = vmul.f32 0.6931472, %v1970_v59  ;;  %v703_v9 = vadd.f32 %v696_v57, %v671_v56 }
 0x2e8   :  { %v702_v12 = vmul.f32 0.6931472, %v1972_v0  ;;  %v704_v13 = vadd.f32 %v698_v62, %v672_v61 }
 0x2e9   :  { %v705_v14 = vadd.f32 %v700_v6, %v673_v5  ;;  %1973 = vtanh.f32 %v703_v9 }
 0x2ea   :  { %v706_v15 = vadd.f32 %v702_v12, %v674_v11  ;;  %1975 = vtanh.f32 %v704_v13 }
 0x2eb   :  { %1977 = vtanh.f32 %v705_v14 }
 0x2ec   :  { %1979 = vtanh.f32 %v706_v15 }
 0x2f3   :  { %v1974_v60 = vpop.eup %1973 }
 0x2f4   :  { %v1976_v28 = vpop.eup %1975  ;;  %v711_v58 = vmul.f32 %v1974_v60, %v2260_v23 }
 0x2f5   :  { %v1978_v31 = vpop.eup %1977  ;;  %v712_v33 = vmul.f32 %v1976_v28, %v2262_v24 }
 0x2f6   :  { %v1980_v34 = vpop.eup %1979  ;;  %v944_v35 = vmul.f32 %v937_v44, %v711_v58  ;;  %v713_v38 = vmul.f32 %v1978_v31, %v2264_v25 }
 0x2f7   :  { %v945_v39 = vmul.f32 %v937_v44, %v712_v33  ;;  %v714_v40 = vmul.f32 %v1980_v34, %v2266_v26 }
 0x2f8   :  { %v981_v43 = vadd.f32 %v974_v30, %v944_v35  ;;  %v946_v45 = vmul.f32 %v941_v29, %v713_v38 }
 0x2f9   :  { %v982_v46 = vadd.f32 %v974_v30, %v945_v39  ;;  %v947_v23 = vmul.f32 %v941_v29, %v714_v40 }
 0x2fa   :  { %1891 = vmatprep.mubr.msk.f32.mxu0 %vm376_vm5, %v981_v43  ;;  %1899 = vmatprep.mubr.msk.f32.mxu1 %vm376_vm5, %v981_v43  ;;  %v983_v48 = vadd.f32 %v978_v37, %v946_v45 }
 0x2fb   :  { %1892 = vmatmul.mubr.msk.f32.vlgmr.msra.gmra.mrb[8].mxu0 %vm376_vm5, %v982_v46  ;;  %1900 = vmatmul.mubr.msk.f32.vlgmr.msra.gmra.mrb[12].mxu1 %vm376_vm5, %v982_v46  ;;  %v984_v24 = vadd.f32 %v978_v37, %v947_v23 }
 0x2fc   :  { %1894 = vmatprep.mubr.msk.f32.mxu0 %vm376_vm5, %v983_v48  ;;  %1902 = vmatprep.mubr.msk.f32.mxu1 %vm376_vm5, %v983_v48 }
 0x2fd   :  { %1906 = vmatpush3.msra.mxu0 %v2236_v36  ;;  %1914 = vmatpush3.msra.mxu1 %v2131_v8 }
 0x2fe   :  { %1918 = vmatprep.subr.mxu1 %v2007_v7 }
 0x2ff   :  { %1895 = vmatmul.mubr.msk.f32.gmra.mrb[10].mxu0 %vm376_vm5, %v984_v24  ;;  %1903 = vmatmul.mubr.msk.f32.gmra.mrb[14].mxu1 %vm376_vm5, %v984_v24 }
 0x300   :  { %1907 = vmatprep.mubr.msk.f32.mxu0 %vm376_vm5, %v981_v43  ;;  %1915 = vmatprep.mubr.msk.f32.mxu1 %vm2008_vm2, %v2007_v7 }
 0x303   :  { %1908 = vmatmul.mubr.msk.f32.vlgmr.msra.gmra.mrb[12].mxu0 %vm376_vm5, %v982_v46 }
 0x304   :  { %1910 = vmatprep.mubr.msk.f32.mxu0 %vm376_vm5, %v983_v48 }
 0x307   :  { %1911 = vmatmul.mubr.msk.f32.gmra.mrb[14].mxu0 %vm376_vm5, %v984_v24 }
 0x308   :  { %1925 = vmatprep.mubr.msk.f32.mxu0 %vm44_vm1, %v2072_v1  ;;  %v1299_v1 = vsub.s32 3, %v2139_v10 }
 0x30a   :  { %v1300_v13 = vrot.slane %v2147_v20, %v1299_v1 }
 0x3ce   :  { %v1893_v8 = vpop.f32.mrb[8].mxu0  ;;  %v1901_v36 = vpop.f32.mrb[12].mxu1 }
 0x3cf   :  { %v1088_v25 = vrot.slane %v1893_v8, 7  ;;  %v1064_v26 = vpop.f32.mrb[9].mxu0  ;;  %v1167_v49 = vpop.f32.mrb[13].mxu1 }
 0x3d0   :  { %v1087_v50 = vrot.slane %v1064_v26, 7 }
 0x3d2   :  { %v1089_v51 = vsel %vm150_vm3, %v1087_v50, %v1088_v25  ;;  %v1097_v52 = vsel %vm150_vm3, 0.0, %v1087_v50  ;;  %v1896_v53 = vpop.f32.mrb[10].mxu0  ;;  %v1904_v54 = vpop.f32.mrb[14].mxu1 }
 0x3d3   :  { %v1186_v55 = vadd.f32 %v1167_v49, %v1097_v52  ;;  %v1091_v56 = vrot.slane %v1896_v53, 7  ;;  %v1074_v57 = vpop.f32.mrb[11].mxu0  ;;  %v1177_v59 = vpop.f32.mrb[15].mxu1  ;;  %v1187_v61 = vadd.f32 %v1901_v36, %v1089_v51 }
 0x3d4   :  { %v1090_v62 = vrot.slane %v1074_v57, 7 }
 0x3d6   :  { %v1092_v63 = vsel %vm150_vm3, %v1090_v62, %v1091_v56  ;;  %v1098_v0 = vsel %vm150_vm3, 0.0, %v1090_v62  ;;  %v1909_v5 = vpop.f32.mrb[12].mxu0 }
 0x3d7   :  { %v1188_v6 = vadd.f32 %v1177_v59, %v1098_v0  ;;  %v1282_v9 = vrot.slane %v1909_v5, 1  ;;  %v1258_v11 = vpop.f32.mrb[13].mxu0  ;;  %v1189_v12 = vadd.f32 %v1904_v54, %v1092_v63 }
 0x3d8   :  { %v1281_v42 = vrot.slane %v1258_v11, 1 }
 0x3d9   :  { %v1291_v14 = vsel %vm351_vm4, %v1282_v9, 0.0 }
 0x3da   :  { %v1294_v15 = vadd.f32 %v1291_v14, %v1187_v61  ;;  %v1283_v16 = vsel %vm351_vm4, %v1281_v42, %v1282_v9  ;;  %v1912_v17 = vpop.f32.mrb[14].mxu0 }
 0x3db   :  { %v1293_v32 = vadd.f32 %v1283_v16, %v1186_v55  ;;  %v1285_v18 = vrot.slane %v1912_v17, 1  ;;  %v1268_v21 = vpop.f32.mrb[15].mxu0 }
 0x3dc   :  { %v2323_v47 = vadd.f32 %v1300_v13, %v1294_v15  ;;  %v1284_v44 = vrot.slane %v1268_v21, 1 }
 0x3dd   :  { %v2325_v27 = vadd.f32 %v1300_v13, %v1293_v32  ;;  %v1292_v60 = vsel %vm351_vm4, %v1285_v18, 0.0  ;;  %v1640_v32 = vld [vmem:[%s2435_s6] sm:$0xf] }
 0x3de   :  { %v1306_v28 = vsel %vm376_vm5, %v2323_v47, 0.0  ;;  %v1324_v58 = vmul.f32 %v2323_v47, %v2323_v47  ;;  %v1296_v29 = vadd.f32 %v1292_v60, %v1189_v12  ;;  %v1286_v30 = vsel %vm351_vm4, %v1284_v44, %v1285_v18  ;;  %1923 = vmatprep.subr.msk.mxu0 %vm57_vm0, %v1640_v32 }
 0x3df   :  { %v1305_v31 = vsel %vm376_vm5, %v2325_v27, 0.0  ;;  %v1323_v33 = vmul.f32 %v2325_v27, %v2325_v27  ;;  %v1295_v34 = vadd.f32 %v1286_v30, %v1188_v6  ;;  %1924 = vmatpush3.msk.msra.mxu0 %vm57_vm0, %v1640_v32 }
 0x3e0   :  { %v1328_v35 = vsel %vm376_vm5, %v1324_v58, 0.0  ;;  %v1307_v37 = vadd.f32 %v1306_v28, %v1305_v31  ;;  %v2338_v38 = vadd.f32 %v1300_v13, %v1296_v29  ;;  %1926 = vmatmul.mubr.msk.f32.vlgmr.msra.gmra.mrb[16].mxu0 %vm44_vm1, %v2084_v3 }
 0x3e1   :  { %v1327_v39 = vsel %vm376_vm5, %v1323_v33, 0.0  ;;  %v2341_v40 = vadd.f32 %v1300_v13, %v1295_v34  ;;  %1928 = vmatprep.mubr.msk.f32.mxu0 %vm44_vm1, %v2077_v2  ;;  %v1518_v33 = vsub.s32 5, %v2139_v10 }
 0x3e2   :  { %v1308_v43 = vrot.slane %v1307_v37, 4  ;;  %v1329_v45 = vadd.f32 %v1328_v35, %v1327_v39  ;;  %v1315_v46 = vsel %vm376_vm5, %v2338_v38, 0.0  ;;  %v1326_v23 = vmul.f32 %v2338_v38, %v2338_v38 }
 0x3e3   :  { %v1314_v48 = vsel %vm376_vm5, %v2341_v40, 0.0  ;;  %v1325_v24 = vmul.f32 %v2341_v40, %v2341_v40  ;;  %v1519_v39 = vrot.slane %v2147_v20, %v1518_v33 }
 0x3e4   :  { %v1309_v8 = vadd.f32 %v1308_v43, %v1307_v37  ;;  %v1330_v36 = vrot.slane %v1329_v45, 4  ;;  %v1337_v25 = vsel %vm376_vm5, %v1326_v23, 0.0  ;;  %v1316_v26 = vadd.f32 %v1315_v46, %v1314_v48  ;;  %1929 = vmatmul.mubr.msk.f32.gmra.mrb[18].mxu0 %vm44_vm1, %v2089_v4 }
 0x3e5   :  { %v1336_v49 = vsel %vm376_vm5, %v1325_v24, 0.0  ;;  %v1509_v4 = vsub.s32 4, %v2139_v10 }
 0x3e6   :  { %v1310_v50 = vrot.slane %v1309_v8, 2  ;;  %v1331_v51 = vadd.f32 %v1330_v36, %v1329_v45  ;;  %v1317_v52 = vrot.slane %v1316_v26, 4  ;;  %v1338_v53 = vadd.f32 %v1337_v25, %v1336_v49 }
 0x3e7   :  { %v1510_v31 = vrot.slane %v2147_v20, %v1509_v4 }
 0x3e8   :  { %v1318_v54 = vadd.f32 %v1317_v52, %v1316_v26  ;;  %v1339_v55 = vrot.slane %v1338_v53, 4  ;;  %v1332_v56 = vrot.slane %v1331_v51, 2  ;;  %v1311_v61 = vadd.f32 %v1310_v50, %v1309_v8 }
 0x3ea   :  { %v1319_v57 = vrot.slane %v1318_v54, 2  ;;  %v1340_v59 = vadd.f32 %v1339_v55, %v1338_v53  ;;  %v1333_v62 = vadd.f32 %v1332_v56, %v1331_v51  ;;  %v1312_v0 = vrot.slane %v1311_v61, 1 }
 0x3ec   :  { %v1320_v1 = vadd.f32 %v1319_v57, %v1318_v54  ;;  %v1341_v63 = vrot.slane %v1340_v59, 2  ;;  %v1334_v6 = vrot.slane %v1333_v62, 1  ;;  %v1313_v13 = vadd.f32 %v1312_v0, %v1311_v61 }
 0x3ee   :  { %v1321_v5 = vrot.slane %v1320_v1, 1  ;;  %v1342_v9 = vadd.f32 %v1341_v63, %v1340_v59  ;;  %v1335_v42 = vadd.f32 %v1334_v6, %v1333_v62 }
 0x3f0   :  { %v1322_v11 = vadd.f32 %v1321_v5, %v1320_v1  ;;  %v1343_v12 = vrot.slane %v1342_v9, 1 }
 0x3f2   :  { %v1344_v14 = vadd.f32 %v1343_v12, %v1342_v9  ;;  %v1347_v15 = vsel %vm419_vm6, %v1322_v11, %v1313_v13 }
 0x3f4   :  { %v1351_v16 = vsel %vm424_vm7, %v1344_v14, %v1335_v42 }
 0x3f5   :  { %v1353_v17 = vsel %vm427_vm8, %v1347_v15, %v1351_v16 }
 0x3f6   :  { %1916 = vmatmul.mubr.msk.f32.vlgmr.msra.gmra.mrb[16].mxu1 %vm376_vm5, %v1353_v17 }
 0x3f7   :  { %1919 = vmatpush3.msra.mxu1 %v2192_v41  ;;  %1920 = vmatprep.mubr.msk.f32.mxu1 %vm2008_vm2, %v2007_v7 }
 0x4b3   :  { %v2372_v7 = vpop.f32.mrb[16].mxu0 }
 0x4b4   :  { %v2374_v21 = vpop.f32.mrb[17].mxu0 }
 0x4b7   :  { %v2376_v44 = vpop.f32.mrb[18].mxu0 }
 0x4b8   :  { %v2378_v60 = vpop.f32.mrb[19].mxu0 }
 0x4c9   :  { %v1423_v41 = vpop.f32.mrb[16].mxu1 }
 0x4ca   :  { %v1917_v18 = vpop.f32.mrb[17].mxu1  ;;  %1921 = vmatmul.mubr.msk.f32.vlgmr.msra.gmra.mrb[18].mxu1 %vm376_vm5, %v1423_v41 }
 0x59d   :  { %v1496_v28 = vpop.f32.mrb[18].mxu1 }
 0x59e   :  { %v1500_v3 = vmul.f32 %v1496_v28, %v1496_v28  ;;  %v1922_v58 = vpop.f32.mrb[19].mxu1 }
 0x5a0   :  { %v1502_v29 = vrot.slane %v1500_v3, 6 }
 0x5a2   :  { %v1504_v2 = vsub.f32 %v1496_v28, %v1502_v29 }
 0x5a4   :  { %v1505_v30 = vadd.f32 1e-05, %v1504_v2 }
 0x5a6   :  { %1981 = vrsqrt.f32 %v1505_v30 }
 0x5b0   :  { %v1982_v34 = vpop.eup %1981 }
 0x5b1   :  { %v1511_v35 = vmul.f32 %v1982_v34, %v1510_v31 }
 0x5b3   :  { %v1513_v37 = vrot.slane %v1511_v35, 2  ;;  %v1527_v43 = vrot.slane %v1511_v35, %v2212_v22 }
 0x5b5   :  { %v1515_v45 = vmul.f32 %v1513_v37, %v1496_v28  ;;  %v1528_v46 = vcombine.high %v1527_v43, %v1527_v43  ;;  %v1535_v23 = vrot.slane %v1527_v43, %v2212_v22  ;;  %v1791_v43 = vld [vmem:[%s2429_s7 + $0x8] ss:$0 sm:$0xff] }
 0x5b7   :  { %v1520_v48 = vsub.f32 %v1519_v39, %v1515_v45  ;;  %v1542_v24 = vrot.slane %v1528_v46, %v2212_v22  ;;  %v1543_v8 = vcombine.high %v1535_v23, %v1535_v23 }
 0x5b9   :  { %v1544_v36 = vcombine.high %v1542_v24, %v1542_v24  ;;  %v1566_v25 = vrot.slane %v1520_v48, %v2212_v22  ;;  %v1548_v10 = vrot.slane %v1543_v8, %v2142_v19  ;;  %v1734_v48 = vadd.f32 %v2372_v7, %v1791_v43 }
 0x5ba   :  { %v1733_v8 = vadd.f32 %v1791_v43, %v2374_v21 }
 0x5bb   :  { %v1567_v26 = vcombine.high %v1566_v25, %v1566_v25  ;;  %v1574_v49 = vrot.slane %v1566_v25, %v2212_v22  ;;  %v1552_v20 = vrot.slane %v1544_v36, %v2142_v19  ;;  %v1556_v51 = vmul.f32 %v1548_v10, %v2323_v47 }
 0x5bc   :  { %v1555_v53 = vmul.f32 %v1548_v10, %v2325_v27  ;;  %v1736_v36 = vadd.f32 %v2376_v44, %v1791_v43 }
 0x5bd   :  { %v1581_v50 = vrot.slane %v1567_v26, %v2212_v22  ;;  %v1585_v52 = vrot.slane %v1574_v49, %v2142_v19  ;;  %v1558_v57 = vmul.f32 %v1552_v20, %v2338_v38  ;;  %v1557_v59 = vmul.f32 %v1552_v20, %v2341_v40 }
 0x5be   :  { %v1735_v26 = vadd.f32 %v1791_v43, %v2378_v60 }
 0x5bf   :  { %v1593_v54 = vadd.f32 %v1585_v52, %v1556_v51  ;;  %v1592_v55 = vadd.f32 %v1585_v52, %v1555_v53  ;;  %v1589_v56 = vrot.slane %v1581_v50, %v2142_v19 }
 0x5c1   :  { %v1601_v61 = vand.u32 2147483647, %v1593_v54  ;;  %v1600_v62 = vand.u32 2147483647, %v1592_v55  ;;  %v1595_v1 = vadd.f32 %v1589_v56, %v1558_v57  ;;  %v2398_v63 = vadd.f32 %v1589_v56, %v1557_v59 }
 0x5c2   :  { %v1597_v18 = vmax.f32 %v1593_v54, 0.0  ;;  %v1596_v3 = vmax.f32 %v1592_v55, 0.0 }
 0x5c3   :  { %v1605_v22 = vsub.f32 0.0, %v1601_v61  ;;  %v1604_v0 = vsub.f32 0.0, %v1600_v62  ;;  %v1603_v47 = vand.u32 2147483647, %v1595_v1  ;;  %v1602_v5 = vand.u32 2147483647, %v2398_v63 }
 0x5c4   :  { %v1599_v31 = vmax.f32 %v1595_v1, 0.0  ;;  %v1598_v34 = vmax.f32 %v2398_v63, 0.0 }
 0x5c5   :  { %v1610_v6 = vmul.f32 1.442695, %v1605_v22  ;;  %v1608_v27 = vmul.f32 1.442695, %v1604_v0  ;;  %v1607_v9 = vsub.f32 0.0, %v1603_v47  ;;  %v1606_v11 = vsub.f32 0.0, %v1602_v5 }
 0x5c7   :  { %1983 = vpow2.f32 %v1610_v6  ;;  %v1614_v19 = vmul.f32 1.442695, %v1607_v9  ;;  %v1612_v38 = vmul.f32 1.442695, %v1606_v11 }
 0x5c8   :  { %1985 = vpow2.f32 %v1608_v27 }
 0x5c9   :  { %1987 = vpow2.f32 %v1614_v19 }
 0x5ca   :  { %1989 = vpow2.f32 %v1612_v38 }
 0x5d1   :  { %v1984_v40 = vpop.eup %1983 }
 0x5d2   :  { %v1986_v12 = vpop.eup %1985  ;;  %v1617_v13 = vadd.f32 1.0, %v1984_v40 }
 0x5d3   :  { %v1616_v42 = vadd.f32 1.0, %v1986_v12  ;;  %v1988_v14 = vpop.eup %1987 }
 0x5d4   :  { %1991 = vlog2.f32 %v1617_v13  ;;  %v1990_v15 = vpop.eup %1989  ;;  %v1619_v16 = vadd.f32 1.0, %v1988_v14 }
 0x5d5   :  { %1993 = vlog2.f32 %v1616_v42  ;;  %v1618_v17 = vadd.f32 1.0, %v1990_v15 }
 0x5d6   :  { %1995 = vlog2.f32 %v1619_v16 }
 0x5d7   :  { %1997 = vlog2.f32 %v1618_v17 }
 0x5de   :  { %v1992_v32 = vpop.eup %1991 }
 0x5df   :  { %v1994_v41 = vpop.eup %1993  ;;  %v1623_v28 = vmul.f32 0.6931472, %v1992_v32 }
 0x5e0   :  { %v1621_v58 = vmul.f32 0.6931472, %v1994_v41  ;;  %v1996_v29 = vpop.eup %1995 }
 0x5e1   :  { %v1629_v2 = vadd.f32 %v1623_v28, %v1597_v18  ;;  %v1998_v30 = vpop.eup %1997  ;;  %v1627_v33 = vmul.f32 0.6931472, %v1996_v29 }
 0x5e2   :  { %v1628_v4 = vadd.f32 %v1621_v58, %v1596_v3  ;;  %v1625_v35 = vmul.f32 0.6931472, %v1998_v30 }
 0x5e3   :  { %1999 = vtanh.f32 %v1629_v2  ;;  %v1631_v37 = vadd.f32 %v1627_v33, %v1599_v31 }
 0x5e4   :  { %2001 = vtanh.f32 %v1628_v4  ;;  %v1630_v39 = vadd.f32 %v1625_v35, %v1598_v34 }
 0x5e5   :  { %2003 = vtanh.f32 %v1631_v37 }
 0x5e6   :  { %2005 = vtanh.f32 %v1630_v39 }
 0x5ed   :  { %v2000_v45 = vpop.eup %1999 }
 0x5ee   :  { %v2002_v46 = vpop.eup %2001  ;;  %v1637_v23 = vmul.f32 %v2000_v45, %v1593_v54 }
 0x5ef   :  { %v1636_v24 = vmul.f32 %v2002_v46, %v1592_v55  ;;  %v2004_v25 = vpop.eup %2003 }
 0x5f0   :  { %v1738_v10 = vadd.f32 %v1734_v48, %v1637_v23  ;;  %v2006_v49 = vpop.eup %2005  ;;  %v1639_v50 = vmul.f32 %v2004_v25, %v1595_v1 }
 0x5f1   :  { %v1737_v20 = vadd.f32 %v1733_v8, %v1636_v24  ;;  %v1638_v51 = vmul.f32 %v2006_v49, %v2398_v63 }
 0x5f2   :  { %1742 = vst.msk [vmem:[%s2436_s10 + $0x8] sm:$0xff] %vm376_vm5, %v1738_v10  ;;  %v1740_v7 = vadd.f32 %v1736_v36, %v1639_v50 }
 0x5f3   :  { %1741 = vst.msk [vmem:[%s2436_s10] sm:$0xff] %vm376_vm5, %v1737_v20  ;;  %v1739_v21 = vadd.f32 %v1735_v26, %v1638_v51 }
 0x5f4   :  { %1744 = vst.msk [vmem:[%s2436_s10 + $0x18] sm:$0xff] %vm376_vm5, %v1740_v7 }
 0x5f5   :  { %1743 = vst.msk [vmem:[%s2436_s10 + $0x10] sm:$0xff] %vm376_vm5, %v1739_v21 }

</bundles_post_ra>
